<compile_context>
chip_gen: v7x
topology: tpu7x:2x2x1
jax: 0.10.0
libtpu: 0.0.40
codegen_flags: <defaults>
</compile_context>

<pallas_src>
import functools

import jax
import jax.numpy as jnp
from jax.experimental import pallas as pl
from jax.experimental.pallas import tpu as pltpu  # noqa: F401  (kept for TPU-target clarity)

# ----------------------- scaled-down model hyper-params -----------------------
PATCH = 8          # CLIP ViT-B/32 uses 32; scaled down
WIDTH = 32         # transformer width (768 in ViT-B/32)
HEADS = 4          # attention heads (12 in ViT-B/32)
DH = WIDTH // HEADS
LAYERS = 2         # transformer depth (12 in ViT-B/32)
OUTPUT_DIM = 16    # visual.output_dim (512 in ViT-B/32)
EMBED_SIZE = 8     # nn.Linear(output_dim, embed_size)


# ------------------------------- helpers (traced inside the kernel) -----------
def _mxu_dot(a, b):
    """MXU matmul: bf16 operands (weights already pre-cast), f32 accumulation."""
    return jnp.dot(a.astype(jnp.bfloat16), b, preferred_element_type=jnp.float32)


def _ln_norm(x):
    """LayerNorm mean/var normalization only (affine folded into the next matmul
    where possible), eps=1e-5 (PyTorch default), f32 math."""
    mu = jnp.mean(x, axis=-1, keepdims=True)
    var = jnp.mean((x - mu) ** 2, axis=-1, keepdims=True)
    return (x - mu) * jax.lax.rsqrt(var + 1e-5)


# ------------------------------- fused kernel ---------------------------------
def _encoder_clip_kernel(
    patches_ref, conv_w_ref, seq_bias_ref, mask_ref,
    ln_pre_g_ref, ln_pre_b_ref,
    w_qkv_ref, b_qkv_ref, w_o_ref, b_o_ref,
    w_fc_ref, b_fc_ref, w_proj_ref, b_proj_ref,
    w_tail_ref, b_tail_ref,
    out_ref,
    *, B):
    scale = 1.0 / float(DH) ** 0.5

    # 1) patch-embed conv (stride == kernel == PATCH, bias=False) as a matmul.
    #    patches is zero-padded with B leading rows, so adding seq_bias (cls+pos on
    #    rows [0:B], pos on patch rows) assembles the full cls-block-first token
    #    sequence in one full-tile add.
    x = _mxu_dot(patches_ref[...], conv_w_ref[...]) + seq_bias_ref[...]   # (BS, W) f32

    # 2) ln_pre (affine kept: it feeds the residual stream, cannot be folded)
    x = _ln_norm(x) * ln_pre_g_ref[...] + ln_pre_b_ref[...]

    mask = mask_ref[...]                       # (BS, BS) additive block-diagonal bias

    # 3) transformer layers (statically unrolled; weights VMEM-resident, bf16)
    for li in range(LAYERS):
        # --- multi-head self-attention (ln1 affine folded into w_qkv/b_qkv) ---
        h = _ln_norm(x)
        qkv = _mxu_dot(h, w_qkv_ref[li]) + b_qkv_ref[pl.ds(li, 1), :]     # (BS, 3W)
        w_o = w_o_ref[li]                                                 # (W, W) bf16

        o = None
        for hd in range(HEADS):                # static head slices, all in vregs
            q = qkv[:, hd * DH:(hd + 1) * DH]
            k = qkv[:, WIDTH + hd * DH:WIDTH + (hd + 1) * DH]
            v = qkv[:, 2 * WIDTH + hd * DH:2 * WIDTH + (hd + 1) * DH]
            s = jax.lax.dot_general(
                q.astype(jnp.bfloat16), k.astype(jnp.bfloat16),
                (((1,), (1,)), ((), ())),
                preferred_element_type=jnp.float32) * scale + mask
            s = s - jnp.max(s, axis=-1, keepdims=True)
            p = jnp.exp(s)
            p = p * pl.reciprocal(jnp.sum(p, axis=-1, keepdims=True), approx=True)
            hv = jnp.dot(p.astype(jnp.bfloat16), v.astype(jnp.bfloat16),
                         preferred_element_type=jnp.float32)              # (BS, DH)
            # sum_h hv @ W_o[h-slice]  ==  concat(heads) @ W_o : stays in vregs.
            oh = jnp.dot(hv.astype(jnp.bfloat16), w_o[hd * DH:(hd + 1) * DH, :],
                         preferred_element_type=jnp.float32)              # (BS, W)
            o = oh if o is None else o + oh
        x = x + o + b_o_ref[pl.ds(li, 1), :]

        # --- MLP block, QuickGELU (ln2 affine folded into w_fc/b_fc) ---
        h = _ln_norm(x)
        h = _mxu_dot(h, w_fc_ref[li]) + b_fc_ref[pl.ds(li, 1), :]
        h = h * jax.nn.sigmoid(1.702 * h)                                 # CLIP QuickGELU
        x = x + _mxu_dot(h, w_proj_ref[li]) + b_proj_ref[pl.ds(li, 1), :]

    # 4) tail on the B cls rows only: ln_post (affine folded into W_tail) then the
    #    pre-folded visual_proj @ embed matmul; one contiguous output store.
    #    (Backbone ran under torch.no_grad() in the reference; forward-only here.)
    xn = _ln_norm(x[:B, :])
    out_ref[...] = _mxu_dot(xn, w_tail_ref[...]) + b_tail_ref[...]


# --------------------------- parameter construction ---------------------------
def init_params(key, in_channels=3):
    def nrm(k, shape, scale=0.02):
        return (scale * jax.random.normal(k, shape)).astype(jnp.float32)

    keys = iter(jax.random.split(key, 64))
    params = {
        "conv_w": nrm(next(keys), (WIDTH, in_channels, PATCH, PATCH)),
        "cls": nrm(next(keys), (WIDTH,)),
        "ln_pre_g": jnp.ones((WIDTH,), jnp.float32),
        "ln_pre_b": jnp.zeros((WIDTH,), jnp.float32),
        "ln_post_g": jnp.ones((WIDTH,), jnp.float32),
        "ln_post_b": jnp.zeros((WIDTH,), jnp.float32),
        "visual_proj": nrm(next(keys), (WIDTH, OUTPUT_DIM)),
        "embed_w": nrm(next(keys), (OUTPUT_DIM, EMBED_SIZE)),  # Linear weight.T
        "embed_b": jnp.zeros((EMBED_SIZE,), jnp.float32),
        "layers": [],
    }
    for _ in range(LAYERS):
        params["layers"].append({
            "ln1_g": jnp.ones((WIDTH,), jnp.float32),
            "ln1_b": jnp.zeros((WIDTH,), jnp.float32),
            "w_qkv": nrm(next(keys), (WIDTH, 3 * WIDTH)),
            "b_qkv": jnp.zeros((3 * WIDTH,), jnp.float32),
            "w_o": nrm(next(keys), (WIDTH, WIDTH)),
            "b_o": jnp.zeros((WIDTH,), jnp.float32),
            "ln2_g": jnp.ones((WIDTH,), jnp.float32),
            "ln2_b": jnp.zeros((WIDTH,), jnp.float32),
            "w_fc": nrm(next(keys), (WIDTH, 4 * WIDTH)),
            "b_fc": jnp.zeros((4 * WIDTH,), jnp.float32),
            "w_proj": nrm(next(keys), (4 * WIDTH, WIDTH)),
            "b_proj": jnp.zeros((WIDTH,), jnp.float32),
        })
    return params


# --------------------------------- forward ------------------------------------
def encoder_clip_forward(images, params):
    """images: (B, C, H, W) float32, NCHW.  Returns (B, EMBED_SIZE)."""
    B, C, H, W = images.shape
    gh, gw = H // PATCH, W // PATCH
    P = gh * gw
    S = P + 1
    BS = B * S
    CPP = C * PATCH * PATCH

    # patch extraction (pure layout) stays in XLA; zero-pad B leading rows so the
    # patch-embed matmul output is already in cls-block-first row order.
    x = images.reshape(B, C, gh, PATCH, gw, PATCH)
    patches = x.transpose(0, 2, 4, 1, 3, 5).reshape(B * P, CPP)
    patches = jnp.concatenate([jnp.zeros((B, CPP), patches.dtype), patches], axis=0)
    patches = patches.astype(jnp.bfloat16)                              # (BS, CPP)
    conv_w = params["conv_w"].reshape(WIDTH, CPP).T.astype(jnp.bfloat16)

    # synthetic positional embedding + cls token, cls-block-first layout:
    # rows [0:B] get (cls + pos[0]); patch rows get pos[1:] tiled per image.
    pos = 0.01 * jnp.arange(S * WIDTH, dtype=jnp.float32).reshape(S, WIDTH) / (S * WIDTH)
    cls_row = params["cls"][None, :] + pos[0:1]
    seq_bias = jnp.concatenate(
        [jnp.tile(cls_row, (B, 1)), jnp.tile(pos[1:], (B, 1))], axis=0)  # (BS, WIDTH)

    # block-diagonal additive attention bias for the cls-first layout
    row_ids = jnp.arange(BS, dtype=jnp.int32)
    img_of = jnp.where(row_ids < B, row_ids, (row_ids - B) // P)
    mask = jnp.where(img_of[:, None] == img_of[None, :], 0.0, -1e30).astype(jnp.float32)

    def stack(name, dtype=jnp.float32):
        return jnp.stack([l[name] for l in params["layers"]], axis=0).astype(dtype)

    # Fold LayerNorm affines into the following matmuls (wrapper-side, f32 math):
    #   (norm * g + b) @ W + c  ==  norm @ (diag(g) W) + (b @ W + c)
    ln1_g, ln1_b = stack("ln1_g"), stack("ln1_b")
    w_qkv, b_qkv = stack("w_qkv"), stack("b_qkv")
    w_qkv_f = ln1_g[:, :, None] * w_qkv
    b_qkv_f = b_qkv + jnp.einsum("lw,lwo->lo", ln1_b, w_qkv)

    ln2_g, ln2_b = stack("ln2_g"), stack("ln2_b")
    w_fc, b_fc = stack("w_fc"), stack("b_fc")
    w_fc_f = ln2_g[:, :, None] * w_fc
    b_fc_f = b_fc + jnp.einsum("lw,lwo->lo", ln2_b, w_fc)

    # Fold tail: ln_post affine + visual_proj (no bias) + embed Linear into one matmul.
    w_tail0 = params["visual_proj"] @ params["embed_w"]                  # (WIDTH, EMBED)
    b_tail = params["embed_b"] + params["ln_post_b"] @ w_tail0
    w_tail = params["ln_post_g"][:, None] * w_tail0

    args = (
        patches, conv_w, seq_bias, mask,
        params["ln_pre_g"].reshape(1, WIDTH), params["ln_pre_b"].reshape(1, WIDTH),
        w_qkv_f.astype(jnp.bfloat16), b_qkv_f,
        stack("w_o", jnp.bfloat16), stack("b_o"),
        w_fc_f.astype(jnp.bfloat16), b_fc_f,
        stack("w_proj", jnp.bfloat16), stack("b_proj"),
        w_tail.astype(jnp.bfloat16), b_tail.reshape(1, EMBED_SIZE),
    )

    def full_spec(a):
        nd = a.ndim
        return pl.BlockSpec(a.shape, lambda nd=nd: (0,) * nd)

    return pl.pallas_call(
        functools.partial(_encoder_clip_kernel, B=B),
        out_shape=jax.ShapeDtypeStruct((B, EMBED_SIZE), jnp.float32),
        in_specs=[full_spec(a) for a in args],
        out_specs=pl.BlockSpec((B, EMBED_SIZE), lambda: (0, 0)),
    )(*args)


# ----------------------------------- main --------------------------------------
if __name__ == "__main__":
    key = jax.random.PRNGKey(0)
    k_img, k_par = jax.random.split(key)

    B, C, Himg, Wimg = 2, 3, 16, 16
    images = jax.random.normal(k_img, (B, C, Himg, Wimg), dtype=jnp.float32)
    params = init_params(k_par, in_channels=C)

    fwd = jax.jit(encoder_clip_forward)
    out = jax.block_until_ready(fwd(images, params))
    assert out.shape == (B, EMBED_SIZE) and out.dtype == jnp.float32
    print("KERNEL_OK")
</pallas_src>

<mosaic_0001>
module attributes {stable_mosaic.version = 11 : i64} {
  func.func @_encoder_clip_kernel(%arg0: memref<10x192xbf16, #tpu.memory_space<vmem>>, %arg1: memref<192x32xbf16, #tpu.memory_space<vmem>>, %arg2: memref<10x32xf32, #tpu.memory_space<vmem>>, %arg3: memref<10x10xf32, #tpu.memory_space<vmem>>, %arg4: memref<1x32xf32, #tpu.memory_space<vmem>>, %arg5: memref<1x32xf32, #tpu.memory_space<vmem>>, %arg6: memref<2x32x96xbf16, #tpu.memory_space<vmem>>, %arg7: memref<2x96xf32, #tpu.memory_space<vmem>>, %arg8: memref<2x32x32xbf16, #tpu.memory_space<vmem>>, %arg9: memref<2x32xf32, #tpu.memory_space<vmem>>, %arg10: memref<2x32x128xbf16, #tpu.memory_space<vmem>>, %arg11: memref<2x128xf32, #tpu.memory_space<vmem>>, %arg12: memref<2x128x32xbf16, #tpu.memory_space<vmem>>, %arg13: memref<2x32xf32, #tpu.memory_space<vmem>>, %arg14: memref<32x8xbf16, #tpu.memory_space<vmem>>, %arg15: memref<1x8xf32, #tpu.memory_space<vmem>>, %arg16: memref<2x8xf32, #tpu.memory_space<vmem>>) attributes {dimension_semantics = [], scalar_prefetch = 0 : i64, scratch_operands = 0 : i64, tpu.core_type = #tpu.core_type<tc>} {
    %c0 = arith.constant 0 : index
    %c0_0 = arith.constant 0 : index
    %0 = vector.load %arg0[%c0, %c0_0] : memref<10x192xbf16, #tpu.memory_space<vmem>>, vector<10x192xbf16>
    %c0_1 = arith.constant 0 : index
    %c0_2 = arith.constant 0 : index
    %1 = vector.load %arg1[%c0_1, %c0_2] : memref<192x32xbf16, #tpu.memory_space<vmem>>, vector<192x32xbf16>
    %cst = arith.constant dense<0.000000e+00> : vector<10x32xf32>
    %2 = tpu.matmul %0, %1, %cst {dimension_numbers = #tpu.dot_dimension_numbers<[1], [0], [0], [1], [0, 0, 1, 1], [], []>} : vector<10x192xbf16>, vector<192x32xbf16>, vector<10x32xf32> -> vector<10x32xf32>
    %c0_3 = arith.constant 0 : index
    %c0_4 = arith.constant 0 : index
    %3 = vector.load %arg2[%c0_3, %c0_4] : memref<10x32xf32, #tpu.memory_space<vmem>>, vector<10x32xf32>
    %4 = arith.addf %2, %3 : vector<10x32xf32>
    %cst_5 = arith.constant dense<0.000000e+00> : vector<10xf32>
    %5 = vector.multi_reduction <add>, %4, %cst_5 [1] : vector<10x32xf32> to vector<10xf32>
    %6 = vector.shape_cast %5 : vector<10xf32> to vector<10x1xf32>
    %cst_6 = arith.constant 3.200000e+01 : f32
    %7 = vector.broadcast %cst_6 : f32 to vector<10x1xf32>
    %8 = arith.divf %6, %7 : vector<10x1xf32>
    %9 = vector.broadcast %8 : vector<10x1xf32> to vector<10x32xf32>
    %10 = arith.subf %4, %9 : vector<10x32xf32>
    %11 = arith.mulf %10, %10 : vector<10x32xf32>
    %cst_7 = arith.constant dense<0.000000e+00> : vector<10xf32>
    %12 = vector.multi_reduction <add>, %11, %cst_7 [1] : vector<10x32xf32> to vector<10xf32>
    %13 = vector.shape_cast %12 : vector<10xf32> to vector<10x1xf32>
    %cst_8 = arith.constant 3.200000e+01 : f32
    %14 = vector.broadcast %cst_8 : f32 to vector<10x1xf32>
    %15 = arith.divf %13, %14 : vector<10x1xf32>
    %16 = vector.broadcast %8 : vector<10x1xf32> to vector<10x32xf32>
    %17 = arith.subf %4, %16 : vector<10x32xf32>
    %cst_9 = arith.constant 9.99999974E-6 : f32
    %18 = vector.broadcast %cst_9 : f32 to vector<10x1xf32>
    %19 = arith.addf %15, %18 : vector<10x1xf32>
    %20 = math.rsqrt %19 : vector<10x1xf32>
    %21 = vector.broadcast %20 : vector<10x1xf32> to vector<10x32xf32>
    %22 = arith.mulf %17, %21 : vector<10x32xf32>
    %c0_10 = arith.constant 0 : index
    %c0_11 = arith.constant 0 : index
    %23 = vector.load %arg4[%c0_10, %c0_11] : memref<1x32xf32, #tpu.memory_space<vmem>>, vector<1x32xf32>
    %24 = vector.broadcast %23 : vector<1x32xf32> to vector<10x32xf32>
    %25 = arith.mulf %22, %24 : vector<10x32xf32>
    %c0_12 = arith.constant 0 : index
    %c0_13 = arith.constant 0 : index
    %26 = vector.load %arg5[%c0_12, %c0_13] : memref<1x32xf32, #tpu.memory_space<vmem>>, vector<1x32xf32>
    %27 = vector.broadcast %26 : vector<1x32xf32> to vector<10x32xf32>
    %28 = arith.addf %25, %27 : vector<10x32xf32>
    %c0_14 = arith.constant 0 : index
    %c0_15 = arith.constant 0 : index
    %29 = vector.load %arg3[%c0_14, %c0_15] : memref<10x10xf32, #tpu.memory_space<vmem>>, vector<10x10xf32>
    %cst_16 = arith.constant dense<0.000000e+00> : vector<10xf32>
    %30 = vector.multi_reduction <add>, %28, %cst_16 [1] : vector<10x32xf32> to vector<10xf32>
    %31 = vector.shape_cast %30 : vector<10xf32> to vector<10x1xf32>
    %cst_17 = arith.constant 3.200000e+01 : f32
    %32 = vector.broadcast %cst_17 : f32 to vector<10x1xf32>
    %33 = arith.divf %31, %32 : vector<10x1xf32>
    %34 = vector.broadcast %33 : vector<10x1xf32> to vector<10x32xf32>
    %35 = arith.subf %28, %34 : vector<10x32xf32>
    %36 = arith.mulf %35, %35 : vector<10x32xf32>
    %cst_18 = arith.constant dense<0.000000e+00> : vector<10xf32>
    %37 = vector.multi_reduction <add>, %36, %cst_18 [1] : vector<10x32xf32> to vector<10xf32>
    %38 = vector.shape_cast %37 : vector<10xf32> to vector<10x1xf32>
    %cst_19 = arith.constant 3.200000e+01 : f32
    %39 = vector.broadcast %cst_19 : f32 to vector<10x1xf32>
    %40 = arith.divf %38, %39 : vector<10x1xf32>
    %41 = vector.broadcast %33 : vector<10x1xf32> to vector<10x32xf32>
    %42 = arith.subf %28, %41 : vector<10x32xf32>
    %cst_20 = arith.constant 9.99999974E-6 : f32
    %43 = vector.broadcast %cst_20 : f32 to vector<10x1xf32>
    %44 = arith.addf %40, %43 : vector<10x1xf32>
    %45 = math.rsqrt %44 : vector<10x1xf32>
    %46 = vector.broadcast %45 : vector<10x1xf32> to vector<10x32xf32>
    %47 = arith.mulf %42, %46 : vector<10x32xf32>
    %c0_21 = arith.constant 0 : index
    %c0_22 = arith.constant 0 : index
    %c0_23 = arith.constant 0 : index
    %48 = vector.load %arg6[%c0_21, %c0_22, %c0_23] : memref<2x32x96xbf16, #tpu.memory_space<vmem>>, vector<1x32x96xbf16>
    %49 = vector.shape_cast %48 : vector<1x32x96xbf16> to vector<32x96xbf16>
    %50 = arith.truncf %47 : vector<10x32xf32> to vector<10x32xbf16>
    %cst_24 = arith.constant dense<0.000000e+00> : vector<10x96xf32>
    %51 = tpu.matmul %50, %49, %cst_24 {dimension_numbers = #tpu.dot_dimension_numbers<[1], [0], [0], [1], [0, 0, 1, 1], [], []>} : vector<10x32xbf16>, vector<32x96xbf16>, vector<10x96xf32> -> vector<10x96xf32>
    %c0_25 = arith.constant 0 : index
    %c0_26 = arith.constant 0 : index
    %52 = vector.load %arg7[%c0_25, %c0_26] : memref<2x96xf32, #tpu.memory_space<vmem>>, vector<1x96xf32>
    %53 = vector.broadcast %52 : vector<1x96xf32> to vector<10x96xf32>
    %54 = arith.addf %51, %53 : vector<10x96xf32>
    %c0_27 = arith.constant 0 : index
    %c0_28 = arith.constant 0 : index
    %c0_29 = arith.constant 0 : index
    %55 = vector.load %arg8[%c0_27, %c0_28, %c0_29] : memref<2x32x32xbf16, #tpu.memory_space<vmem>>, vector<1x32x32xbf16>
    %56 = vector.shape_cast %55 : vector<1x32x32xbf16> to vector<32x32xbf16>
    %57 = vector.extract_strided_slice %54 {offsets = [0, 0], sizes = [10, 8], strides = [1, 1]} : vector<10x96xf32> to vector<10x8xf32>
    %58 = vector.extract_strided_slice %54 {offsets = [0, 32], sizes = [10, 8], strides = [1, 1]} : vector<10x96xf32> to vector<10x8xf32>
    %59 = vector.extract_strided_slice %54 {offsets = [0, 64], sizes = [10, 8], strides = [1, 1]} : vector<10x96xf32> to vector<10x8xf32>
    %60 = arith.truncf %57 : vector<10x8xf32> to vector<10x8xbf16>
    %61 = arith.truncf %58 : vector<10x8xf32> to vector<10x8xbf16>
    %cst_30 = arith.constant dense<0.000000e+00> : vector<10x10xf32>
    %62 = tpu.matmul %60, %61, %cst_30 {dimension_numbers = #tpu.dot_dimension_numbers<[1], [1], [0], [0], [0, 0, 1, 0], [], []>} : vector<10x8xbf16>, vector<10x8xbf16>, vector<10x10xf32> -> vector<10x10xf32>
    %cst_31 = arith.constant 0.353553385 : f32
    %63 = vector.broadcast %cst_31 : f32 to vector<10x10xf32>
    %64 = arith.mulf %62, %63 : vector<10x10xf32>
    %65 = arith.addf %64, %29 : vector<10x10xf32>
    %cst_32 = arith.constant dense<0xFF800000> : vector<10xf32>
    %66 = vector.multi_reduction <maximumf>, %65, %cst_32 [1] : vector<10x10xf32> to vector<10xf32>
    %67 = vector.shape_cast %66 : vector<10xf32> to vector<10x1xf32>
    %68 = vector.broadcast %67 : vector<10x1xf32> to vector<10x10xf32>
    %69 = arith.subf %65, %68 : vector<10x10xf32>
    %70 = math.exp %69 : vector<10x10xf32>
    %cst_33 = arith.constant dense<0.000000e+00> : vector<10xf32>
    %71 = vector.multi_reduction <add>, %70, %cst_33 [1] : vector<10x10xf32> to vector<10xf32>
    %72 = vector.shape_cast %71 : vector<10xf32> to vector<10x1xf32>
    %73 = tpu.reciprocal %72 {approx = true} : vector<10x1xf32> -> vector<10x1xf32>
    %74 = vector.broadcast %73 : vector<10x1xf32> to vector<10x10xf32>
    %75 = arith.mulf %70, %74 : vector<10x10xf32>
    %76 = arith.truncf %75 : vector<10x10xf32> to vector<10x10xbf16>
    %77 = arith.truncf %59 : vector<10x8xf32> to vector<10x8xbf16>
    %cst_34 = arith.constant dense<0.000000e+00> : vector<10x8xf32>
    %78 = tpu.matmul %76, %77, %cst_34 {dimension_numbers = #tpu.dot_dimension_numbers<[1], [0], [0], [1], [0, 0, 1, 1], [], []>} : vector<10x10xbf16>, vector<10x8xbf16>, vector<10x8xf32> -> vector<10x8xf32>
    %79 = arith.truncf %78 : vector<10x8xf32> to vector<10x8xbf16>
    %80 = vector.extract_strided_slice %56 {offsets = [0, 0], sizes = [8, 32], strides = [1, 1]} : vector<32x32xbf16> to vector<8x32xbf16>
    %cst_35 = arith.constant dense<0.000000e+00> : vector<10x32xf32>
    %81 = tpu.matmul %79, %80, %cst_35 {dimension_numbers = #tpu.dot_dimension_numbers<[1], [0], [0], [1], [0, 0, 1, 1], [], []>} : vector<10x8xbf16>, vector<8x32xbf16>, vector<10x32xf32> -> vector<10x32xf32>
    %82 = vector.extract_strided_slice %54 {offsets = [0, 8], sizes = [10, 8], strides = [1, 1]} : vector<10x96xf32> to vector<10x8xf32>
    %83 = vector.extract_strided_slice %54 {offsets = [0, 40], sizes = [10, 8], strides = [1, 1]} : vector<10x96xf32> to vector<10x8xf32>
    %84 = vector.extract_strided_slice %54 {offsets = [0, 72], sizes = [10, 8], strides = [1, 1]} : vector<10x96xf32> to vector<10x8xf32>
    %85 = arith.truncf %82 : vector<10x8xf32> to vector<10x8xbf16>
    %86 = arith.truncf %83 : vector<10x8xf32> to vector<10x8xbf16>
    %cst_36 = arith.constant dense<0.000000e+00> : vector<10x10xf32>
    %87 = tpu.matmul %85, %86, %cst_36 {dimension_numbers = #tpu.dot_dimension_numbers<[1], [1], [0], [0], [0, 0, 1, 0], [], []>} : vector<10x8xbf16>, vector<10x8xbf16>, vector<10x10xf32> -> vector<10x10xf32>
    %cst_37 = arith.constant 0.353553385 : f32
    %88 = vector.broadcast %cst_37 : f32 to vector<10x10xf32>
    %89 = arith.mulf %87, %88 : vector<10x10xf32>
    %90 = arith.addf %89, %29 : vector<10x10xf32>
    %cst_38 = arith.constant dense<0xFF800000> : vector<10xf32>
    %91 = vector.multi_reduction <maximumf>, %90, %cst_38 [1] : vector<10x10xf32> to vector<10xf32>
    %92 = vector.shape_cast %91 : vector<10xf32> to vector<10x1xf32>
    %93 = vector.broadcast %92 : vector<10x1xf32> to vector<10x10xf32>
    %94 = arith.subf %90, %93 : vector<10x10xf32>
    %95 = math.exp %94 : vector<10x10xf32>
    %cst_39 = arith.constant dense<0.000000e+00> : vector<10xf32>
    %96 = vector.multi_reduction <add>, %95, %cst_39 [1] : vector<10x10xf32> to vector<10xf32>
    %97 = vector.shape_cast %96 : vector<10xf32> to vector<10x1xf32>
    %98 = tpu.reciprocal %97 {approx = true} : vector<10x1xf32> -> vector<10x1xf32>
    %99 = vector.broadcast %98 : vector<10x1xf32> to vector<10x10xf32>
    %100 = arith.mulf %95, %99 : vector<10x10xf32>
    %101 = arith.truncf %100 : vector<10x10xf32> to vector<10x10xbf16>
    %102 = arith.truncf %84 : vector<10x8xf32> to vector<10x8xbf16>
    %cst_40 = arith.constant dense<0.000000e+00> : vector<10x8xf32>
    %103 = tpu.matmul %101, %102, %cst_40 {dimension_numbers = #tpu.dot_dimension_numbers<[1], [0], [0], [1], [0, 0, 1, 1], [], []>} : vector<10x10xbf16>, vector<10x8xbf16>, vector<10x8xf32> -> vector<10x8xf32>
    %104 = arith.truncf %103 : vector<10x8xf32> to vector<10x8xbf16>
    %105 = vector.extract_strided_slice %56 {offsets = [8, 0], sizes = [8, 32], strides = [1, 1]} : vector<32x32xbf16> to vector<8x32xbf16>
    %cst_41 = arith.constant dense<0.000000e+00> : vector<10x32xf32>
    %106 = tpu.matmul %104, %105, %cst_41 {dimension_numbers = #tpu.dot_dimension_numbers<[1], [0], [0], [1], [0, 0, 1, 1], [], []>} : vector<10x8xbf16>, vector<8x32xbf16>, vector<10x32xf32> -> vector<10x32xf32>
    %107 = arith.addf %81, %106 : vector<10x32xf32>
    %108 = vector.extract_strided_slice %54 {offsets = [0, 16], sizes = [10, 8], strides = [1, 1]} : vector<10x96xf32> to vector<10x8xf32>
    %109 = vector.extract_strided_slice %54 {offsets = [0, 48], sizes = [10, 8], strides = [1, 1]} : vector<10x96xf32> to vector<10x8xf32>
    %110 = vector.extract_strided_slice %54 {offsets = [0, 80], sizes = [10, 8], strides = [1, 1]} : vector<10x96xf32> to vector<10x8xf32>
    %111 = arith.truncf %108 : vector<10x8xf32> to vector<10x8xbf16>
    %112 = arith.truncf %109 : vector<10x8xf32> to vector<10x8xbf16>
    %cst_42 = arith.constant dense<0.000000e+00> : vector<10x10xf32>
    %113 = tpu.matmul %111, %112, %cst_42 {dimension_numbers = #tpu.dot_dimension_numbers<[1], [1], [0], [0], [0, 0, 1, 0], [], []>} : vector<10x8xbf16>, vector<10x8xbf16>, vector<10x10xf32> -> vector<10x10xf32>
    %cst_43 = arith.constant 0.353553385 : f32
    %114 = vector.broadcast %cst_43 : f32 to vector<10x10xf32>
    %115 = arith.mulf %113, %114 : vector<10x10xf32>
    %116 = arith.addf %115, %29 : vector<10x10xf32>
    %cst_44 = arith.constant dense<0xFF800000> : vector<10xf32>
    %117 = vector.multi_reduction <maximumf>, %116, %cst_44 [1] : vector<10x10xf32> to vector<10xf32>
    %118 = vector.shape_cast %117 : vector<10xf32> to vector<10x1xf32>
    %119 = vector.broadcast %118 : vector<10x1xf32> to vector<10x10xf32>
    %120 = arith.subf %116, %119 : vector<10x10xf32>
    %121 = math.exp %120 : vector<10x10xf32>
    %cst_45 = arith.constant dense<0.000000e+00> : vector<10xf32>
    %122 = vector.multi_reduction <add>, %121, %cst_45 [1] : vector<10x10xf32> to vector<10xf32>
    %123 = vector.shape_cast %122 : vector<10xf32> to vector<10x1xf32>
    %124 = tpu.reciprocal %123 {approx = true} : vector<10x1xf32> -> vector<10x1xf32>
    %125 = vector.broadcast %124 : vector<10x1xf32> to vector<10x10xf32>
    %126 = arith.mulf %121, %125 : vector<10x10xf32>
    %127 = arith.truncf %126 : vector<10x10xf32> to vector<10x10xbf16>
    %128 = arith.truncf %110 : vector<10x8xf32> to vector<10x8xbf16>
    %cst_46 = arith.constant dense<0.000000e+00> : vector<10x8xf32>
    %129 = tpu.matmul %127, %128, %cst_46 {dimension_numbers = #tpu.dot_dimension_numbers<[1], [0], [0], [1], [0, 0, 1, 1], [], []>} : vector<10x10xbf16>, vector<10x8xbf16>, vector<10x8xf32> -> vector<10x8xf32>
    %130 = arith.truncf %129 : vector<10x8xf32> to vector<10x8xbf16>
    %131 = vector.extract_strided_slice %56 {offsets = [16, 0], sizes = [8, 32], strides = [1, 1]} : vector<32x32xbf16> to vector<8x32xbf16>
    %cst_47 = arith.constant dense<0.000000e+00> : vector<10x32xf32>
    %132 = tpu.matmul %130, %131, %cst_47 {dimension_numbers = #tpu.dot_dimension_numbers<[1], [0], [0], [1], [0, 0, 1, 1], [], []>} : vector<10x8xbf16>, vector<8x32xbf16>, vector<10x32xf32> -> vector<10x32xf32>
    %133 = arith.addf %107, %132 : vector<10x32xf32>
    %134 = vector.extract_strided_slice %54 {offsets = [0, 24], sizes = [10, 8], strides = [1, 1]} : vector<10x96xf32> to vector<10x8xf32>
    %135 = vector.extract_strided_slice %54 {offsets = [0, 56], sizes = [10, 8], strides = [1, 1]} : vector<10x96xf32> to vector<10x8xf32>
    %136 = vector.extract_strided_slice %54 {offsets = [0, 88], sizes = [10, 8], strides = [1, 1]} : vector<10x96xf32> to vector<10x8xf32>
    %137 = arith.truncf %134 : vector<10x8xf32> to vector<10x8xbf16>
    %138 = arith.truncf %135 : vector<10x8xf32> to vector<10x8xbf16>
    %cst_48 = arith.constant dense<0.000000e+00> : vector<10x10xf32>
    %139 = tpu.matmul %137, %138, %cst_48 {dimension_numbers = #tpu.dot_dimension_numbers<[1], [1], [0], [0], [0, 0, 1, 0], [], []>} : vector<10x8xbf16>, vector<10x8xbf16>, vector<10x10xf32> -> vector<10x10xf32>
    %cst_49 = arith.constant 0.353553385 : f32
    %140 = vector.broadcast %cst_49 : f32 to vector<10x10xf32>
    %141 = arith.mulf %139, %140 : vector<10x10xf32>
    %142 = arith.addf %141, %29 : vector<10x10xf32>
    %cst_50 = arith.constant dense<0xFF800000> : vector<10xf32>
    %143 = vector.multi_reduction <maximumf>, %142, %cst_50 [1] : vector<10x10xf32> to vector<10xf32>
    %144 = vector.shape_cast %143 : vector<10xf32> to vector<10x1xf32>
    %145 = vector.broadcast %144 : vector<10x1xf32> to vector<10x10xf32>
    %146 = arith.subf %142, %145 : vector<10x10xf32>
    %147 = math.exp %146 : vector<10x10xf32>
    %cst_51 = arith.constant dense<0.000000e+00> : vector<10xf32>
    %148 = vector.multi_reduction <add>, %147, %cst_51 [1] : vector<10x10xf32> to vector<10xf32>
    %149 = vector.shape_cast %148 : vector<10xf32> to vector<10x1xf32>
    %150 = tpu.reciprocal %149 {approx = true} : vector<10x1xf32> -> vector<10x1xf32>
    %151 = vector.broadcast %150 : vector<10x1xf32> to vector<10x10xf32>
    %152 = arith.mulf %147, %151 : vector<10x10xf32>
    %153 = arith.truncf %152 : vector<10x10xf32> to vector<10x10xbf16>
    %154 = arith.truncf %136 : vector<10x8xf32> to vector<10x8xbf16>
    %cst_52 = arith.constant dense<0.000000e+00> : vector<10x8xf32>
    %155 = tpu.matmul %153, %154, %cst_52 {dimension_numbers = #tpu.dot_dimension_numbers<[1], [0], [0], [1], [0, 0, 1, 1], [], []>} : vector<10x10xbf16>, vector<10x8xbf16>, vector<10x8xf32> -> vector<10x8xf32>
    %156 = arith.truncf %155 : vector<10x8xf32> to vector<10x8xbf16>
    %157 = vector.extract_strided_slice %56 {offsets = [24, 0], sizes = [8, 32], strides = [1, 1]} : vector<32x32xbf16> to vector<8x32xbf16>
    %cst_53 = arith.constant dense<0.000000e+00> : vector<10x32xf32>
    %158 = tpu.matmul %156, %157, %cst_53 {dimension_numbers = #tpu.dot_dimension_numbers<[1], [0], [0], [1], [0, 0, 1, 1], [], []>} : vector<10x8xbf16>, vector<8x32xbf16>, vector<10x32xf32> -> vector<10x32xf32>
    %159 = arith.addf %133, %158 : vector<10x32xf32>
    %160 = arith.addf %28, %159 : vector<10x32xf32>
    %c0_54 = arith.constant 0 : index
    %c0_55 = arith.constant 0 : index
    %161 = vector.load %arg9[%c0_54, %c0_55] : memref<2x32xf32, #tpu.memory_space<vmem>>, vector<1x32xf32>
    %162 = vector.broadcast %161 : vector<1x32xf32> to vector<10x32xf32>
    %163 = arith.addf %160, %162 : vector<10x32xf32>
    %cst_56 = arith.constant dense<0.000000e+00> : vector<10xf32>
    %164 = vector.multi_reduction <add>, %163, %cst_56 [1] : vector<10x32xf32> to vector<10xf32>
    %165 = vector.shape_cast %164 : vector<10xf32> to vector<10x1xf32>
    %cst_57 = arith.constant 3.200000e+01 : f32
    %166 = vector.broadcast %cst_57 : f32 to vector<10x1xf32>
    %167 = arith.divf %165, %166 : vector<10x1xf32>
    %168 = vector.broadcast %167 : vector<10x1xf32> to vector<10x32xf32>
    %169 = arith.subf %163, %168 : vector<10x32xf32>
    %170 = arith.mulf %169, %169 : vector<10x32xf32>
    %cst_58 = arith.constant dense<0.000000e+00> : vector<10xf32>
    %171 = vector.multi_reduction <add>, %170, %cst_58 [1] : vector<10x32xf32> to vector<10xf32>
    %172 = vector.shape_cast %171 : vector<10xf32> to vector<10x1xf32>
    %cst_59 = arith.constant 3.200000e+01 : f32
    %173 = vector.broadcast %cst_59 : f32 to vector<10x1xf32>
    %174 = arith.divf %172, %173 : vector<10x1xf32>
    %175 = vector.broadcast %167 : vector<10x1xf32> to vector<10x32xf32>
    %176 = arith.subf %163, %175 : vector<10x32xf32>
    %cst_60 = arith.constant 9.99999974E-6 : f32
    %177 = vector.broadcast %cst_60 : f32 to vector<10x1xf32>
    %178 = arith.addf %174, %177 : vector<10x1xf32>
    %179 = math.rsqrt %178 : vector<10x1xf32>
    %180 = vector.broadcast %179 : vector<10x1xf32> to vector<10x32xf32>
    %181 = arith.mulf %176, %180 : vector<10x32xf32>
    %c0_61 = arith.constant 0 : index
    %c0_62 = arith.constant 0 : index
    %c0_63 = arith.constant 0 : index
    %182 = vector.load %arg10[%c0_61, %c0_62, %c0_63] : memref<2x32x128xbf16, #tpu.memory_space<vmem>>, vector<1x32x128xbf16>
    %183 = vector.shape_cast %182 : vector<1x32x128xbf16> to vector<32x128xbf16>
    %184 = arith.truncf %181 : vector<10x32xf32> to vector<10x32xbf16>
    %cst_64 = arith.constant dense<0.000000e+00> : vector<10x128xf32>
    %185 = tpu.matmul %184, %183, %cst_64 {dimension_numbers = #tpu.dot_dimension_numbers<[1], [0], [0], [1], [0, 0, 1, 1], [], []>} : vector<10x32xbf16>, vector<32x128xbf16>, vector<10x128xf32> -> vector<10x128xf32>
    %c0_65 = arith.constant 0 : index
    %c0_66 = arith.constant 0 : index
    %186 = vector.load %arg11[%c0_65, %c0_66] : memref<2x128xf32, #tpu.memory_space<vmem>>, vector<1x128xf32>
    %187 = vector.broadcast %186 : vector<1x128xf32> to vector<10x128xf32>
    %188 = arith.addf %185, %187 : vector<10x128xf32>
    %cst_67 = arith.constant 1.702000e+00 : f32
    %189 = vector.broadcast %cst_67 : f32 to vector<10x128xf32>
    %190 = arith.mulf %189, %188 : vector<10x128xf32>
    %191 = arith.negf %190 : vector<10x128xf32>
    %192 = math.exp %191 : vector<10x128xf32>
    %cst_68 = arith.constant 1.000000e+00 : f32
    %193 = vector.broadcast %cst_68 : f32 to vector<10x128xf32>
    %194 = arith.addf %193, %192 : vector<10x128xf32>
    %195 = arith.divf %193, %194 : vector<10x128xf32>
    %196 = arith.mulf %188, %195 : vector<10x128xf32>
    %c0_69 = arith.constant 0 : index
    %c0_70 = arith.constant 0 : index
    %c0_71 = arith.constant 0 : index
    %197 = vector.load %arg12[%c0_69, %c0_70, %c0_71] : memref<2x128x32xbf16, #tpu.memory_space<vmem>>, vector<1x128x32xbf16>
    %198 = vector.shape_cast %197 : vector<1x128x32xbf16> to vector<128x32xbf16>
    %199 = arith.truncf %196 : vector<10x128xf32> to vector<10x128xbf16>
    %cst_72 = arith.constant dense<0.000000e+00> : vector<10x32xf32>
    %200 = tpu.matmul %199, %198, %cst_72 {dimension_numbers = #tpu.dot_dimension_numbers<[1], [0], [0], [1], [0, 0, 1, 1], [], []>} : vector<10x128xbf16>, vector<128x32xbf16>, vector<10x32xf32> -> vector<10x32xf32>
    %201 = arith.addf %163, %200 : vector<10x32xf32>
    %c0_73 = arith.constant 0 : index
    %c0_74 = arith.constant 0 : index
    %202 = vector.load %arg13[%c0_73, %c0_74] : memref<2x32xf32, #tpu.memory_space<vmem>>, vector<1x32xf32>
    %203 = vector.broadcast %202 : vector<1x32xf32> to vector<10x32xf32>
    %204 = arith.addf %201, %203 : vector<10x32xf32>
    %cst_75 = arith.constant dense<0.000000e+00> : vector<10xf32>
    %205 = vector.multi_reduction <add>, %204, %cst_75 [1] : vector<10x32xf32> to vector<10xf32>
    %206 = vector.shape_cast %205 : vector<10xf32> to vector<10x1xf32>
    %cst_76 = arith.constant 3.200000e+01 : f32
    %207 = vector.broadcast %cst_76 : f32 to vector<10x1xf32>
    %208 = arith.divf %206, %207 : vector<10x1xf32>
    %209 = vector.broadcast %208 : vector<10x1xf32> to vector<10x32xf32>
    %210 = arith.subf %204, %209 : vector<10x32xf32>
    %211 = arith.mulf %210, %210 : vector<10x32xf32>
    %cst_77 = arith.constant dense<0.000000e+00> : vector<10xf32>
    %212 = vector.multi_reduction <add>, %211, %cst_77 [1] : vector<10x32xf32> to vector<10xf32>
    %213 = vector.shape_cast %212 : vector<10xf32> to vector<10x1xf32>
    %cst_78 = arith.constant 3.200000e+01 : f32
    %214 = vector.broadcast %cst_78 : f32 to vector<10x1xf32>
    %215 = arith.divf %213, %214 : vector<10x1xf32>
    %216 = vector.broadcast %208 : vector<10x1xf32> to vector<10x32xf32>
    %217 = arith.subf %204, %216 : vector<10x32xf32>
    %cst_79 = arith.constant 9.99999974E-6 : f32
    %218 = vector.broadcast %cst_79 : f32 to vector<10x1xf32>
    %219 = arith.addf %215, %218 : vector<10x1xf32>
    %220 = math.rsqrt %219 : vector<10x1xf32>
    %221 = vector.broadcast %220 : vector<10x1xf32> to vector<10x32xf32>
    %222 = arith.mulf %217, %221 : vector<10x32xf32>
    %c1 = arith.constant 1 : index
    %c0_80 = arith.constant 0 : index
    %c0_81 = arith.constant 0 : index
    %223 = vector.load %arg6[%c1, %c0_80, %c0_81] : memref<2x32x96xbf16, #tpu.memory_space<vmem>>, vector<1x32x96xbf16>
    %224 = vector.shape_cast %223 : vector<1x32x96xbf16> to vector<32x96xbf16>
    %225 = arith.truncf %222 : vector<10x32xf32> to vector<10x32xbf16>
    %cst_82 = arith.constant dense<0.000000e+00> : vector<10x96xf32>
    %226 = tpu.matmul %225, %224, %cst_82 {dimension_numbers = #tpu.dot_dimension_numbers<[1], [0], [0], [1], [0, 0, 1, 1], [], []>} : vector<10x32xbf16>, vector<32x96xbf16>, vector<10x96xf32> -> vector<10x96xf32>
    %c1_83 = arith.constant 1 : index
    %c0_84 = arith.constant 0 : index
    %227 = vector.load %arg7[%c1_83, %c0_84] : memref<2x96xf32, #tpu.memory_space<vmem>>, vector<1x96xf32>
    %228 = vector.broadcast %227 : vector<1x96xf32> to vector<10x96xf32>
    %229 = arith.addf %226, %228 : vector<10x96xf32>
    %c1_85 = arith.constant 1 : index
    %c0_86 = arith.constant 0 : index
    %c0_87 = arith.constant 0 : index
    %230 = vector.load %arg8[%c1_85, %c0_86, %c0_87] : memref<2x32x32xbf16, #tpu.memory_space<vmem>>, vector<1x32x32xbf16>
    %231 = vector.shape_cast %230 : vector<1x32x32xbf16> to vector<32x32xbf16>
    %232 = vector.extract_strided_slice %229 {offsets = [0, 0], sizes = [10, 8], strides = [1, 1]} : vector<10x96xf32> to vector<10x8xf32>
    %233 = vector.extract_strided_slice %229 {offsets = [0, 32], sizes = [10, 8], strides = [1, 1]} : vector<10x96xf32> to vector<10x8xf32>
    %234 = vector.extract_strided_slice %229 {offsets = [0, 64], sizes = [10, 8], strides = [1, 1]} : vector<10x96xf32> to vector<10x8xf32>
    %235 = arith.truncf %232 : vector<10x8xf32> to vector<10x8xbf16>
    %236 = arith.truncf %233 : vector<10x8xf32> to vector<10x8xbf16>
    %cst_88 = arith.constant dense<0.000000e+00> : vector<10x10xf32>
    %237 = tpu.matmul %235, %236, %cst_88 {dimension_numbers = #tpu.dot_dimension_numbers<[1], [1], [0], [0], [0, 0, 1, 0], [], []>} : vector<10x8xbf16>, vector<10x8xbf16>, vector<10x10xf32> -> vector<10x10xf32>
    %cst_89 = arith.constant 0.353553385 : f32
    %238 = vector.broadcast %cst_89 : f32 to vector<10x10xf32>
    %239 = arith.mulf %237, %238 : vector<10x10xf32>
    %240 = arith.addf %239, %29 : vector<10x10xf32>
    %cst_90 = arith.constant dense<0xFF800000> : vector<10xf32>
    %241 = vector.multi_reduction <maximumf>, %240, %cst_90 [1] : vector<10x10xf32> to vector<10xf32>
    %242 = vector.shape_cast %241 : vector<10xf32> to vector<10x1xf32>
    %243 = vector.broadcast %242 : vector<10x1xf32> to vector<10x10xf32>
    %244 = arith.subf %240, %243 : vector<10x10xf32>
    %245 = math.exp %244 : vector<10x10xf32>
    %cst_91 = arith.constant dense<0.000000e+00> : vector<10xf32>
    %246 = vector.multi_reduction <add>, %245, %cst_91 [1] : vector<10x10xf32> to vector<10xf32>
    %247 = vector.shape_cast %246 : vector<10xf32> to vector<10x1xf32>
    %248 = tpu.reciprocal %247 {approx = true} : vector<10x1xf32> -> vector<10x1xf32>
    %249 = vector.broadcast %248 : vector<10x1xf32> to vector<10x10xf32>
    %250 = arith.mulf %245, %249 : vector<10x10xf32>
    %251 = arith.truncf %250 : vector<10x10xf32> to vector<10x10xbf16>
    %252 = arith.truncf %234 : vector<10x8xf32> to vector<10x8xbf16>
    %cst_92 = arith.constant dense<0.000000e+00> : vector<10x8xf32>
    %253 = tpu.matmul %251, %252, %cst_92 {dimension_numbers = #tpu.dot_dimension_numbers<[1], [0], [0], [1], [0, 0, 1, 1], [], []>} : vector<10x10xbf16>, vector<10x8xbf16>, vector<10x8xf32> -> vector<10x8xf32>
    %254 = arith.truncf %253 : vector<10x8xf32> to vector<10x8xbf16>
    %255 = vector.extract_strided_slice %231 {offsets = [0, 0], sizes = [8, 32], strides = [1, 1]} : vector<32x32xbf16> to vector<8x32xbf16>
    %cst_93 = arith.constant dense<0.000000e+00> : vector<10x32xf32>
    %256 = tpu.matmul %254, %255, %cst_93 {dimension_numbers = #tpu.dot_dimension_numbers<[1], [0], [0], [1], [0, 0, 1, 1], [], []>} : vector<10x8xbf16>, vector<8x32xbf16>, vector<10x32xf32> -> vector<10x32xf32>
    %257 = vector.extract_strided_slice %229 {offsets = [0, 8], sizes = [10, 8], strides = [1, 1]} : vector<10x96xf32> to vector<10x8xf32>
    %258 = vector.extract_strided_slice %229 {offsets = [0, 40], sizes = [10, 8], strides = [1, 1]} : vector<10x96xf32> to vector<10x8xf32>
    %259 = vector.extract_strided_slice %229 {offsets = [0, 72], sizes = [10, 8], strides = [1, 1]} : vector<10x96xf32> to vector<10x8xf32>
    %260 = arith.truncf %257 : vector<10x8xf32> to vector<10x8xbf16>
    %261 = arith.truncf %258 : vector<10x8xf32> to vector<10x8xbf16>
    %cst_94 = arith.constant dense<0.000000e+00> : vector<10x10xf32>
    %262 = tpu.matmul %260, %261, %cst_94 {dimension_numbers = #tpu.dot_dimension_numbers<[1], [1], [0], [0], [0, 0, 1, 0], [], []>} : vector<10x8xbf16>, vector<10x8xbf16>, vector<10x10xf32> -> vector<10x10xf32>
    %cst_95 = arith.constant 0.353553385 : f32
    %263 = vector.broadcast %cst_95 : f32 to vector<10x10xf32>
    %264 = arith.mulf %262, %263 : vector<10x10xf32>
    %265 = arith.addf %264, %29 : vector<10x10xf32>
    %cst_96 = arith.constant dense<0xFF800000> : vector<10xf32>
    %266 = vector.multi_reduction <maximumf>, %265, %cst_96 [1] : vector<10x10xf32> to vector<10xf32>
    %267 = vector.shape_cast %266 : vector<10xf32> to vector<10x1xf32>
    %268 = vector.broadcast %267 : vector<10x1xf32> to vector<10x10xf32>
    %269 = arith.subf %265, %268 : vector<10x10xf32>
    %270 = math.exp %269 : vector<10x10xf32>
    %cst_97 = arith.constant dense<0.000000e+00> : vector<10xf32>
    %271 = vector.multi_reduction <add>, %270, %cst_97 [1] : vector<10x10xf32> to vector<10xf32>
    %272 = vector.shape_cast %271 : vector<10xf32> to vector<10x1xf32>
    %273 = tpu.reciprocal %272 {approx = true} : vector<10x1xf32> -> vector<10x1xf32>
    %274 = vector.broadcast %273 : vector<10x1xf32> to vector<10x10xf32>
    %275 = arith.mulf %270, %274 : vector<10x10xf32>
    %276 = arith.truncf %275 : vector<10x10xf32> to vector<10x10xbf16>
    %277 = arith.truncf %259 : vector<10x8xf32> to vector<10x8xbf16>
    %cst_98 = arith.constant dense<0.000000e+00> : vector<10x8xf32>
    %278 = tpu.matmul %276, %277, %cst_98 {dimension_numbers = #tpu.dot_dimension_numbers<[1], [0], [0], [1], [0, 0, 1, 1], [], []>} : vector<10x10xbf16>, vector<10x8xbf16>, vector<10x8xf32> -> vector<10x8xf32>
    %279 = arith.truncf %278 : vector<10x8xf32> to vector<10x8xbf16>
    %280 = vector.extract_strided_slice %231 {offsets = [8, 0], sizes = [8, 32], strides = [1, 1]} : vector<32x32xbf16> to vector<8x32xbf16>
    %cst_99 = arith.constant dense<0.000000e+00> : vector<10x32xf32>
    %281 = tpu.matmul %279, %280, %cst_99 {dimension_numbers = #tpu.dot_dimension_numbers<[1], [0], [0], [1], [0, 0, 1, 1], [], []>} : vector<10x8xbf16>, vector<8x32xbf16>, vector<10x32xf32> -> vector<10x32xf32>
    %282 = arith.addf %256, %281 : vector<10x32xf32>
    %283 = vector.extract_strided_slice %229 {offsets = [0, 16], sizes = [10, 8], strides = [1, 1]} : vector<10x96xf32> to vector<10x8xf32>
    %284 = vector.extract_strided_slice %229 {offsets = [0, 48], sizes = [10, 8], strides = [1, 1]} : vector<10x96xf32> to vector<10x8xf32>
    %285 = vector.extract_strided_slice %229 {offsets = [0, 80], sizes = [10, 8], strides = [1, 1]} : vector<10x96xf32> to vector<10x8xf32>
    %286 = arith.truncf %283 : vector<10x8xf32> to vector<10x8xbf16>
    %287 = arith.truncf %284 : vector<10x8xf32> to vector<10x8xbf16>
    %cst_100 = arith.constant dense<0.000000e+00> : vector<10x10xf32>
    %288 = tpu.matmul %286, %287, %cst_100 {dimension_numbers = #tpu.dot_dimension_numbers<[1], [1], [0], [0], [0, 0, 1, 0], [], []>} : vector<10x8xbf16>, vector<10x8xbf16>, vector<10x10xf32> -> vector<10x10xf32>
    %cst_101 = arith.constant 0.353553385 : f32
    %289 = vector.broadcast %cst_101 : f32 to vector<10x10xf32>
    %290 = arith.mulf %288, %289 : vector<10x10xf32>
    %291 = arith.addf %290, %29 : vector<10x10xf32>
    %cst_102 = arith.constant dense<0xFF800000> : vector<10xf32>
    %292 = vector.multi_reduction <maximumf>, %291, %cst_102 [1] : vector<10x10xf32> to vector<10xf32>
    %293 = vector.shape_cast %292 : vector<10xf32> to vector<10x1xf32>
    %294 = vector.broadcast %293 : vector<10x1xf32> to vector<10x10xf32>
    %295 = arith.subf %291, %294 : vector<10x10xf32>
    %296 = math.exp %295 : vector<10x10xf32>
    %cst_103 = arith.constant dense<0.000000e+00> : vector<10xf32>
    %297 = vector.multi_reduction <add>, %296, %cst_103 [1] : vector<10x10xf32> to vector<10xf32>
    %298 = vector.shape_cast %297 : vector<10xf32> to vector<10x1xf32>
    %299 = tpu.reciprocal %298 {approx = true} : vector<10x1xf32> -> vector<10x1xf32>
    %300 = vector.broadcast %299 : vector<10x1xf32> to vector<10x10xf32>
    %301 = arith.mulf %296, %300 : vector<10x10xf32>
    %302 = arith.truncf %301 : vector<10x10xf32> to vector<10x10xbf16>
    %303 = arith.truncf %285 : vector<10x8xf32> to vector<10x8xbf16>
    %cst_104 = arith.constant dense<0.000000e+00> : vector<10x8xf32>
    %304 = tpu.matmul %302, %303, %cst_104 {dimension_numbers = #tpu.dot_dimension_numbers<[1], [0], [0], [1], [0, 0, 1, 1], [], []>} : vector<10x10xbf16>, vector<10x8xbf16>, vector<10x8xf32> -> vector<10x8xf32>
    %305 = arith.truncf %304 : vector<10x8xf32> to vector<10x8xbf16>
    %306 = vector.extract_strided_slice %231 {offsets = [16, 0], sizes = [8, 32], strides = [1, 1]} : vector<32x32xbf16> to vector<8x32xbf16>
    %cst_105 = arith.constant dense<0.000000e+00> : vector<10x32xf32>
    %307 = tpu.matmul %305, %306, %cst_105 {dimension_numbers = #tpu.dot_dimension_numbers<[1], [0], [0], [1], [0, 0, 1, 1], [], []>} : vector<10x8xbf16>, vector<8x32xbf16>, vector<10x32xf32> -> vector<10x32xf32>
    %308 = arith.addf %282, %307 : vector<10x32xf32>
    %309 = vector.extract_strided_slice %229 {offsets = [0, 24], sizes = [10, 8], strides = [1, 1]} : vector<10x96xf32> to vector<10x8xf32>
    %310 = vector.extract_strided_slice %229 {offsets = [0, 56], sizes = [10, 8], strides = [1, 1]} : vector<10x96xf32> to vector<10x8xf32>
    %311 = vector.extract_strided_slice %229 {offsets = [0, 88], sizes = [10, 8], strides = [1, 1]} : vector<10x96xf32> to vector<10x8xf32>
    %312 = arith.truncf %309 : vector<10x8xf32> to vector<10x8xbf16>
    %313 = arith.truncf %310 : vector<10x8xf32> to vector<10x8xbf16>
    %cst_106 = arith.constant dense<0.000000e+00> : vector<10x10xf32>
    %314 = tpu.matmul %312, %313, %cst_106 {dimension_numbers = #tpu.dot_dimension_numbers<[1], [1], [0], [0], [0, 0, 1, 0], [], []>} : vector<10x8xbf16>, vector<10x8xbf16>, vector<10x10xf32> -> vector<10x10xf32>
    %cst_107 = arith.constant 0.353553385 : f32
    %315 = vector.broadcast %cst_107 : f32 to vector<10x10xf32>
    %316 = arith.mulf %314, %315 : vector<10x10xf32>
    %317 = arith.addf %316, %29 : vector<10x10xf32>
    %cst_108 = arith.constant dense<0xFF800000> : vector<10xf32>
    %318 = vector.multi_reduction <maximumf>, %317, %cst_108 [1] : vector<10x10xf32> to vector<10xf32>
    %319 = vector.shape_cast %318 : vector<10xf32> to vector<10x1xf32>
    %320 = vector.broadcast %319 : vector<10x1xf32> to vector<10x10xf32>
    %321 = arith.subf %317, %320 : vector<10x10xf32>
    %322 = math.exp %321 : vector<10x10xf32>
    %cst_109 = arith.constant dense<0.000000e+00> : vector<10xf32>
    %323 = vector.multi_reduction <add>, %322, %cst_109 [1] : vector<10x10xf32> to vector<10xf32>
    %324 = vector.shape_cast %323 : vector<10xf32> to vector<10x1xf32>
    %325 = tpu.reciprocal %324 {approx = true} : vector<10x1xf32> -> vector<10x1xf32>
    %326 = vector.broadcast %325 : vector<10x1xf32> to vector<10x10xf32>
    %327 = arith.mulf %322, %326 : vector<10x10xf32>
    %328 = arith.truncf %327 : vector<10x10xf32> to vector<10x10xbf16>
    %329 = arith.truncf %311 : vector<10x8xf32> to vector<10x8xbf16>
    %cst_110 = arith.constant dense<0.000000e+00> : vector<10x8xf32>
    %330 = tpu.matmul %328, %329, %cst_110 {dimension_numbers = #tpu.dot_dimension_numbers<[1], [0], [0], [1], [0, 0, 1, 1], [], []>} : vector<10x10xbf16>, vector<10x8xbf16>, vector<10x8xf32> -> vector<10x8xf32>
    %331 = arith.truncf %330 : vector<10x8xf32> to vector<10x8xbf16>
    %332 = vector.extract_strided_slice %231 {offsets = [24, 0], sizes = [8, 32], strides = [1, 1]} : vector<32x32xbf16> to vector<8x32xbf16>
    %cst_111 = arith.constant dense<0.000000e+00> : vector<10x32xf32>
    %333 = tpu.matmul %331, %332, %cst_111 {dimension_numbers = #tpu.dot_dimension_numbers<[1], [0], [0], [1], [0, 0, 1, 1], [], []>} : vector<10x8xbf16>, vector<8x32xbf16>, vector<10x32xf32> -> vector<10x32xf32>
    %334 = arith.addf %308, %333 : vector<10x32xf32>
    %335 = arith.addf %204, %334 : vector<10x32xf32>
    %c1_112 = arith.constant 1 : index
    %c0_113 = arith.constant 0 : index
    %336 = vector.load %arg9[%c1_112, %c0_113] : memref<2x32xf32, #tpu.memory_space<vmem>>, vector<1x32xf32>
    %337 = vector.broadcast %336 : vector<1x32xf32> to vector<10x32xf32>
    %338 = arith.addf %335, %337 : vector<10x32xf32>
    %cst_114 = arith.constant dense<0.000000e+00> : vector<10xf32>
    %339 = vector.multi_reduction <add>, %338, %cst_114 [1] : vector<10x32xf32> to vector<10xf32>
    %340 = vector.shape_cast %339 : vector<10xf32> to vector<10x1xf32>
    %cst_115 = arith.constant 3.200000e+01 : f32
    %341 = vector.broadcast %cst_115 : f32 to vector<10x1xf32>
    %342 = arith.divf %340, %341 : vector<10x1xf32>
    %343 = vector.broadcast %342 : vector<10x1xf32> to vector<10x32xf32>
    %344 = arith.subf %338, %343 : vector<10x32xf32>
    %345 = arith.mulf %344, %344 : vector<10x32xf32>
    %cst_116 = arith.constant dense<0.000000e+00> : vector<10xf32>
    %346 = vector.multi_reduction <add>, %345, %cst_116 [1] : vector<10x32xf32> to vector<10xf32>
    %347 = vector.shape_cast %346 : vector<10xf32> to vector<10x1xf32>
    %cst_117 = arith.constant 3.200000e+01 : f32
    %348 = vector.broadcast %cst_117 : f32 to vector<10x1xf32>
    %349 = arith.divf %347, %348 : vector<10x1xf32>
    %350 = vector.broadcast %342 : vector<10x1xf32> to vector<10x32xf32>
    %351 = arith.subf %338, %350 : vector<10x32xf32>
    %cst_118 = arith.constant 9.99999974E-6 : f32
    %352 = vector.broadcast %cst_118 : f32 to vector<10x1xf32>
    %353 = arith.addf %349, %352 : vector<10x1xf32>
    %354 = math.rsqrt %353 : vector<10x1xf32>
    %355 = vector.broadcast %354 : vector<10x1xf32> to vector<10x32xf32>
    %356 = arith.mulf %351, %355 : vector<10x32xf32>
    %c1_119 = arith.constant 1 : index
    %c0_120 = arith.constant 0 : index
    %c0_121 = arith.constant 0 : index
    %357 = vector.load %arg10[%c1_119, %c0_120, %c0_121] : memref<2x32x128xbf16, #tpu.memory_space<vmem>>, vector<1x32x128xbf16>
    %358 = vector.shape_cast %357 : vector<1x32x128xbf16> to vector<32x128xbf16>
    %359 = arith.truncf %356 : vector<10x32xf32> to vector<10x32xbf16>
    %cst_122 = arith.constant dense<0.000000e+00> : vector<10x128xf32>
    %360 = tpu.matmul %359, %358, %cst_122 {dimension_numbers = #tpu.dot_dimension_numbers<[1], [0], [0], [1], [0, 0, 1, 1], [], []>} : vector<10x32xbf16>, vector<32x128xbf16>, vector<10x128xf32> -> vector<10x128xf32>
    %c1_123 = arith.constant 1 : index
    %c0_124 = arith.constant 0 : index
    %361 = vector.load %arg11[%c1_123, %c0_124] : memref<2x128xf32, #tpu.memory_space<vmem>>, vector<1x128xf32>
    %362 = vector.broadcast %361 : vector<1x128xf32> to vector<10x128xf32>
    %363 = arith.addf %360, %362 : vector<10x128xf32>
    %cst_125 = arith.constant 1.702000e+00 : f32
    %364 = vector.broadcast %cst_125 : f32 to vector<10x128xf32>
    %365 = arith.mulf %364, %363 : vector<10x128xf32>
    %366 = arith.negf %365 : vector<10x128xf32>
    %367 = math.exp %366 : vector<10x128xf32>
    %cst_126 = arith.constant 1.000000e+00 : f32
    %368 = vector.broadcast %cst_126 : f32 to vector<10x128xf32>
    %369 = arith.addf %368, %367 : vector<10x128xf32>
    %370 = arith.divf %368, %369 : vector<10x128xf32>
    %371 = arith.mulf %363, %370 : vector<10x128xf32>
    %c1_127 = arith.constant 1 : index
    %c0_128 = arith.constant 0 : index
    %c0_129 = arith.constant 0 : index
    %372 = vector.load %arg12[%c1_127, %c0_128, %c0_129] : memref<2x128x32xbf16, #tpu.memory_space<vmem>>, vector<1x128x32xbf16>
    %373 = vector.shape_cast %372 : vector<1x128x32xbf16> to vector<128x32xbf16>
    %374 = arith.truncf %371 : vector<10x128xf32> to vector<10x128xbf16>
    %cst_130 = arith.constant dense<0.000000e+00> : vector<10x32xf32>
    %375 = tpu.matmul %374, %373, %cst_130 {dimension_numbers = #tpu.dot_dimension_numbers<[1], [0], [0], [1], [0, 0, 1, 1], [], []>} : vector<10x128xbf16>, vector<128x32xbf16>, vector<10x32xf32> -> vector<10x32xf32>
    %376 = arith.addf %338, %375 : vector<10x32xf32>
    %c1_131 = arith.constant 1 : index
    %c0_132 = arith.constant 0 : index
    %377 = vector.load %arg13[%c1_131, %c0_132] : memref<2x32xf32, #tpu.memory_space<vmem>>, vector<1x32xf32>
    %378 = vector.broadcast %377 : vector<1x32xf32> to vector<10x32xf32>
    %379 = arith.addf %376, %378 : vector<10x32xf32>
    %380 = vector.extract_strided_slice %379 {offsets = [0, 0], sizes = [2, 32], strides = [1, 1]} : vector<10x32xf32> to vector<2x32xf32>
    %cst_133 = arith.constant dense<0.000000e+00> : vector<2xf32>
    %381 = vector.multi_reduction <add>, %380, %cst_133 [1] : vector<2x32xf32> to vector<2xf32>
    %382 = vector.shape_cast %381 : vector<2xf32> to vector<2x1xf32>
    %cst_134 = arith.constant 3.200000e+01 : f32
    %383 = vector.broadcast %cst_134 : f32 to vector<2x1xf32>
    %384 = arith.divf %382, %383 : vector<2x1xf32>
    %385 = vector.broadcast %384 : vector<2x1xf32> to vector<2x32xf32>
    %386 = arith.subf %380, %385 : vector<2x32xf32>
    %387 = arith.mulf %386, %386 : vector<2x32xf32>
    %cst_135 = arith.constant dense<0.000000e+00> : vector<2xf32>
    %388 = vector.multi_reduction <add>, %387, %cst_135 [1] : vector<2x32xf32> to vector<2xf32>
    %389 = vector.shape_cast %388 : vector<2xf32> to vector<2x1xf32>
    %cst_136 = arith.constant 3.200000e+01 : f32
    %390 = vector.broadcast %cst_136 : f32 to vector<2x1xf32>
    %391 = arith.divf %389, %390 : vector<2x1xf32>
    %392 = vector.broadcast %384 : vector<2x1xf32> to vector<2x32xf32>
    %393 = arith.subf %380, %392 : vector<2x32xf32>
    %cst_137 = arith.constant 9.99999974E-6 : f32
    %394 = vector.broadcast %cst_137 : f32 to vector<2x1xf32>
    %395 = arith.addf %391, %394 : vector<2x1xf32>
    %396 = math.rsqrt %395 : vector<2x1xf32>
    %397 = vector.broadcast %396 : vector<2x1xf32> to vector<2x32xf32>
    %398 = arith.mulf %393, %397 : vector<2x32xf32>
    %c0_138 = arith.constant 0 : index
    %c0_139 = arith.constant 0 : index
    %399 = vector.load %arg14[%c0_138, %c0_139] : memref<32x8xbf16, #tpu.memory_space<vmem>>, vector<32x8xbf16>
    %400 = arith.truncf %398 : vector<2x32xf32> to vector<2x32xbf16>
    %cst_140 = arith.constant dense<0.000000e+00> : vector<2x8xf32>
    %401 = tpu.matmul %400, %399, %cst_140 {dimension_numbers = #tpu.dot_dimension_numbers<[1], [0], [0], [1], [0, 0, 1, 1], [], []>} : vector<2x32xbf16>, vector<32x8xbf16>, vector<2x8xf32> -> vector<2x8xf32>
    %c0_141 = arith.constant 0 : index
    %c0_142 = arith.constant 0 : index
    %402 = vector.load %arg15[%c0_141, %c0_142] : memref<1x8xf32, #tpu.memory_space<vmem>>, vector<1x8xf32>
    %403 = vector.broadcast %402 : vector<1x8xf32> to vector<2x8xf32>
    %404 = arith.addf %401, %403 : vector<2x8xf32>
    %c0_143 = arith.constant 0 : index
    %c0_144 = arith.constant 0 : index
    %405 = vector.load %arg16[%c0_143, %c0_144] : memref<2x8xf32, #tpu.memory_space<vmem>>, vector<2x8xf32>
    tpu.vector_store %arg16[%c0_143, %c0_144], %404 {strides = array<i32>} : memref<2x8xf32, #tpu.memory_space<vmem>>, vector<2x8xf32>,
    return
  }
}

</mosaic_0001>

<bundles_post_ra>
// kernel: encoder_clip_forward.1
= control target key start
LH: loop header
LB: loop body
LE: loop exit
PB: predicated region body
PF: predicated region fallthrough
CT: control target
= control target key end

     0   :  { %s3682_s0 = inlined_call_operand.vmem [shape: bf16[10,192], index: 0, kind: input, shape index: {}]   ;;  %s3683_s1 = inlined_call_operand.vmem [shape: bf16[192,32], index: 1, kind: input, shape index: {}]   ;;  %s3684_s2 = inlined_call_operand.vmem [shape: f32[10,32], index: 2, kind: input, shape index: {}]   ;;  %s3685_s3 = inlined_call_operand.vmem [shape: f32[10,10], index: 3, kind: input, shape index: {}]   ;;  %s3686_s4 = inlined_call_operand.vmem [shape: f32[1,32], index: 4, kind: input, shape index: {}]   ;;  %s3687_s5 = inlined_call_operand.vmem [shape: f32[1,32], index: 5, kind: input, shape index: {}]   ;;  %s3688_s6 = inlined_call_operand.vmem [shape: bf16[2,32,96], index: 6, kind: input, shape index: {}]   ;;  %s3689_s7 = inlined_call_operand.vmem [shape: f32[2,96], index: 7, kind: input, shape index: {}]   ;;  %s3690_s8 = inlined_call_operand.vmem [shape: bf16[2,32,32], index: 8, kind: input, shape index: {}]   ;;  %s3691_s9 = inlined_call_operand.vmem [shape: f32[2,32], index: 9, kind: input, shape index: {}]   ;;  %s3692_s10 = inlined_call_operand.vmem [shape: bf16[2,32,128], index: 10, kind: input, shape index: {}]   ;;  %s3693_s11 = inlined_call_operand.vmem [shape: f32[2,128], index: 11, kind: input, shape index: {}]   ;;  %s3694_s12 = inlined_call_operand.vmem [shape: bf16[2,128,32], index: 12, kind: input, shape index: {}]   ;;  %s3695_s13 = inlined_call_operand.vmem [shape: f32[2,32], index: 13, kind: input, shape index: {}]   ;;  %s3696_s14 = inlined_call_operand.vmem [shape: bf16[32,8], index: 14, kind: input, shape index: {}]   ;;  %s3697_s15 = inlined_call_operand.vmem [shape: f32[1,8], index: 15, kind: input, shape index: {}]   ;;  %s3698_s16 = inlined_call_operand.hbm [shape: f32[2,8], index: 16, kind: output, shape index: {}]  }
   0x1   :  { %3700 = sst [smem:[#allocation5_spill]] %s3682_s0 }
   0x2   :  { %v2857_v0 = vld [vmem:[%s3683_s1] sm:$0xff]   ;;  %v3026_v1 = vmov 0   ;;  %v2858_v2 = vld [vmem:[%s3683_s1 + $0x8] sm:$0xff]   ;;  %v2859_v3 = vld [vmem:[%s3683_s1 + $0x10] sm:$0xff]   ;;  %vm164_vm0 = vcmask 523264   ;;  %s3701_s18 = sld [smem:[#allocation5_spill]] }
   0x3   :  { %168 = vmatprep.subr.bf16.mxu0 %v3026_v1  ;;  %v2860_v4 = vld [vmem:[%s3683_s1 + $0x18] sm:$0xff]   ;;  %v2861_v5 = vld [vmem:[%s3683_s1 + $0x20] sm:$0xff]   ;;  %v2862_v7 = vld [vmem:[%s3683_s1 + $0x28] sm:$0xff]  }
   0x4   :  { %169 = vmatpush1.bf16.msra.mxu0 %v2857_v0  ;;  %v2863_v8 = vld [vmem:[%s3683_s1 + $0x30] sm:$0xff]   ;;  %v2864_v9 = vld [vmem:[%s3683_s1 + $0x38] sm:$0xff]   ;;  %v2865_v10 = vld [vmem:[%s3683_s1 + $0x40] sm:$0xff]  }
   0x5   :  { %170 = vmatprep.subr.bf16.mxu0 %v3026_v1 }
   0x8   :  { %171 = vmatpush1.bf16.msra.mxu0 %v2858_v2  ;;  %v2871_v6 = vld [vmem:[%s3701_s18 + $0x4] ss:$8 sps:$4 sm:$0x1f]  }
   0x9   :  { %172 = vmatprep.subr.bf16.mxu0 %v3026_v1  ;;  %2438 = vmatprep.mubr.msk.bf16.mxu0 %vm164_vm0, %v2871_v6 }
   0xc   :  { %173 = vmatpush1.bf16.msra.mxu0 %v2859_v3 }
   0xd   :  { %174 = vmatprep.subr.bf16.mxu0 %v3026_v1 }
  0x10   :  { %175 = vmatpush1.bf16.msra.mxu0 %v2860_v4 }
  0x11   :  { %176 = vmatprep.subr.bf16.mxu0 %v3026_v1 }
  0x14   :  { %177 = vmatpush1.bf16.msra.mxu0 %v2861_v5 }
  0x15   :  { %178 = vmatprep.subr.bf16.mxu0 %v3026_v1 }
  0x18   :  { %179 = vmatpush1.bf16.msra.mxu0 %v2862_v7 }
  0x19   :  { %180 = vmatprep.subr.bf16.mxu0 %v3026_v1 }
  0x1c   :  { %181 = vmatpush1.bf16.msra.mxu0 %v2863_v8 }
  0x1d   :  { %182 = vmatprep.subr.bf16.mxu0 %v3026_v1 }
  0x20   :  { %183 = vmatpush1.bf16.msra.mxu0 %v2864_v9 }
  0x21   :  { %184 = vmatprep.subr.bf16.mxu0 %v3026_v1 }
  0x22   :  { %21 = vsyncpa [#allocation3], 0  ;;  %v2866_v11 = vld [vmem:[%s3683_s1 + $0x48] sm:$0xff]   ;;  %v2867_v12 = vld [vmem:[%s3683_s1 + $0x50] sm:$0xff]   ;;  %vm209_vm1 = vcmask 261120   ;;  %vm213_vm2 = vcmask 254976  }
  0x23   :  { %v2868_v13 = vld [vmem:[%s3683_s1 + $0x58] sm:$0xff]   ;;  %v2869_v14 = vld [vmem:[%s3701_s18] ss:$8 sps:$4 sm:$0x1f]   ;;  %v3027_v0 = vmov 0.0   ;;  %vm3028_vm3 = vmmov 0  }
  0x24   :  { %185 = vmatpush1.bf16.msra.mxu0 %v2865_v10  ;;  %v81_v15 = vld [vmem:[%s3684_s2] sm:$0xff]  ;;  %v82_v17 = vld [vmem:[%s3684_s2 + $0x8] sm:$0x3]  ;;  %2618 = vmatprep.subr.bf16.mxu1 %v3027_v0  ;;  %s3029_s30 = smov 96   ;;  %s3030_s0 = smov 88   ;;  %vm358_vm4 = vcmask 64512  }
  0x25   :  { %186 = vmatprep.subr.bf16.mxu0 %v3026_v1  ;;  %v2439_v42 = vld [vmem:[%s3686_s4] ss:$0 sm:$0xff]  ;;  %2622 = vmatprep.mubr.msk.bf16.mxu1 %vm3028_vm3, %v3027_v0  ;;  %s3031_s17 = smov 120   ;;  %vm410_vm5 = vcmask 80896   ;;  %vm414_vm6 = vcmask 74752   ;;  %s3032_s23 = smov 64  }
  0x26   :  { %v2440_v44 = vld [vmem:[%s3687_s5] ss:$0 sm:$0xff]  ;;  %vm440_vm7 = vcmask 1044480   ;;  %s3033_s24 = smov 80   ;;  %s3034_s1 = smov 112   ;;  %vm617_vm8 = vcmask 1043456  }
  0x27   :  { %v2872_v63 = vld [vmem:[%s3688_s6] sm:$0xff]   ;;  %s3035_s2 = smov 56   ;;  %s3036_s26 = smov 48   ;;  %vm2408_vm9 = vcmask 58368  }
  0x28   :  { %187 = vmatpush1.bf16.msra.mxu0 %v2866_v11  ;;  %2619 = vmatpush3.bf16.msra.mxu1 %v2872_v63  ;;  %s3037_s27 = smov 104   ;;  %s3038_s28 = smov 72  }
  0x29   :  { %188 = vmatprep.subr.bf16.mxu0 %v3026_v1  ;;  %2620 = vmatprep.subr.bf16.mxu1 %v3027_v0  ;;  %s3039_s20 = smov 40   ;;  %s3040_s18 = smov [#allocation2]  }
  0x2a   :  { %s2416_s25 = sshll.u32 %s3040_s18, 4  ;;  %s2417_s25 = int_to_ptr.vmem [resolvable:$true] %s2416_s25 }
  0x2b   :  { %p3007_p1 = scmp.lt.s32.totalorder %s2417_s25, %s2417_s25 }
  0x2c   :  { %189 = vmatpush1.bf16.msra.mxu0 %v2867_v12 }
  0x2d   :  { %190 = vmatprep.subr.bf16.mxu0 %v3026_v1  ;;  %v2873_v1 = vld [vmem:[%s3688_s6 + $0x8] sm:$0xff]  }
  0x2e   :  { %2621 = vmatpush3.bf16.msra.mxu1 %v2873_v1 }
  0x2f   :  { %2626 = vmatprep.subr.bf16.mxu1 %v3027_v0 }
  0x30   :  { %191 = vmatpush1.bf16.msra.mxu0 %v2868_v13  ;;  %v2441_v13 = vld [vmem:[%s3689_s7] ss:$0 sm:$0xff] }
  0x31   :  { %2668 = vmatprep.subr.bf16.mxu0 %v3027_v0 }
  0x33   :  { %201 = vmatmul.mubr.bf16.vlgmr.msra.gmra.mrb[0].mxu0 %v2869_v14 }
  0x34   :  { %2670 = vmatprep.mubr.msk.bf16.mxu0 %vm3028_vm3, %v3027_v0 }
 0x106   :  { %v202_v16 = vpop.f32.mrb[0].mxu0 }
 0x107   :  { %v203_v18 = vadd.f32 %v202_v16, %v81_v15  ;;  %v204_v19 = vpop.f32.mrb[1].mxu0 }
 0x108   :  { %v205_v20 = vpop.f32.mrb[2].mxu0 }
 0x109   :  { %v206_v21 = vadd.f32 %v205_v20, %v82_v17  ;;  %v207_v22 = vpop.f32.mrb[3].mxu0  ;;  %v210_v23 = vsel %vm209_vm1, %v203_v18, 0.0 }
 0x10a   :  { %211 = vadd.xlane.f32.xlu0 %v210_v23 }
 0x10b   :  { %v214_v24 = vsel %vm213_vm2, %v206_v21, 0.0 }
 0x10e   :  { %215 = vadd.xlane.f32.xlu0 %v214_v24  ;;  %v3233_v24 = vld [vmem:[%s3685_s3] sm:$0xff] }
 0x197   :  { %v212_v25 = vpop.xlane.xlu0 %211 }
 0x198   :  { %v218_v26 = vmul.f32 0.03125, %v212_v25 }
 0x19a   :  { %v220_v27 = vsub.f32 %v203_v18, %v218_v26 }
 0x19b   :  { %v216_v28 = vpop.xlane.xlu0 %215 }
 0x19c   :  { %v219_v29 = vmul.f32 0.03125, %v216_v28  ;;  %v222_v30 = vmul.f32 %v220_v27, %v220_v27  ;;  %v3238_v28 = vld [vmem:[%s3685_s3 + $0x8] sm:$0x3] }
 0x19e   :  { %v221_v31 = vsub.f32 %v206_v21, %v219_v29  ;;  %v224_v32 = vsel %vm209_vm1, %v222_v30, 0.0 }
 0x19f   :  { %225 = vadd.xlane.f32.xlu1 %v224_v32 }
 0x1a0   :  { %v223_v33 = vmul.f32 %v221_v31, %v221_v31 }
 0x1a2   :  { %v227_v34 = vsel %vm213_vm2, %v223_v33, 0.0 }
 0x1a3   :  { %228 = vadd.xlane.f32.xlu1 %v227_v34 }
 0x22c   :  { %v226_v35 = vpop.xlane.xlu1 %225 }
 0x22d   :  { %v230_v36 = vmul.f32 0.03125, %v226_v35 }
 0x22f   :  { %v232_v37 = vadd.f32 1e-05, %v230_v36 }
 0x230   :  { %v229_v38 = vpop.xlane.xlu1 %228 }
 0x231   :  { %2898 = vrsqrt.f32 %v232_v37  ;;  %v231_v39 = vmul.f32 0.03125, %v229_v38 }
 0x233   :  { %v233_v40 = vadd.f32 1e-05, %v231_v39 }
 0x235   :  { %2900 = vrsqrt.f32 %v233_v40 }
 0x23b   :  { %v2899_v41 = vpop.eup %2898 }
 0x23c   :  { %v236_v43 = vmul.f32 %v2899_v41, %v220_v27 }
 0x23e   :  { %v245_v45 = vmul.f32 %v2439_v42, %v236_v43 }
 0x23f   :  { %v2901_v46 = vpop.eup %2900 }
 0x240   :  { %v3184_v47 = vadd.f32 %v2440_v44, %v245_v45  ;;  %v237_v48 = vmul.f32 %v2901_v46, %v221_v31 }
 0x242   :  { %v258_v49 = vsel %vm209_vm1, %v3184_v47, 0.0  ;;  %v246_v50 = vmul.f32 %v2439_v42, %v237_v48 }
 0x243   :  { %259 = vadd.xlane.f32.xlu0 %v258_v49 }
 0x244   :  { %v3188_v51 = vadd.f32 %v2440_v44, %v246_v50 }
 0x246   :  { %v261_v52 = vsel %vm213_vm2, %v3188_v51, 0.0 }
 0x247   :  { %262 = vadd.xlane.f32.xlu1 %v261_v52 }
 0x2d0   :  { %v260_v53 = vpop.xlane.xlu0 %259 }
 0x2d1   :  { %v264_v54 = vmul.f32 0.03125, %v260_v53 }
 0x2d3   :  { %v266_v55 = vsub.f32 %v3184_v47, %v264_v54 }
 0x2d4   :  { %v263_v56 = vpop.xlane.xlu1 %262 }
 0x2d5   :  { %v265_v57 = vmul.f32 0.03125, %v263_v56  ;;  %v268_v58 = vmul.f32 %v266_v55, %v266_v55 }
 0x2d7   :  { %v267_v59 = vsub.f32 %v3188_v51, %v265_v57  ;;  %v270_v60 = vsel %vm209_vm1, %v268_v58, 0.0 }
 0x2d8   :  { %271 = vadd.xlane.f32.xlu0 %v270_v60 }
 0x2d9   :  { %v269_v61 = vmul.f32 %v267_v59, %v267_v59 }
 0x2db   :  { %v273_v62 = vsel %vm213_vm2, %v269_v61, 0.0 }
 0x2dc   :  { %274 = vadd.xlane.f32.xlu1 %v273_v62 }
 0x365   :  { %v272_v2 = vpop.xlane.xlu0 %271 }
 0x366   :  { %v276_v3 = vmul.f32 0.03125, %v272_v2 }
 0x368   :  { %v278_v4 = vadd.f32 1e-05, %v276_v3 }
 0x369   :  { %v275_v5 = vpop.xlane.xlu1 %274 }
 0x36a   :  { %v277_v6 = vmul.f32 0.03125, %v275_v5  ;;  %2902 = vrsqrt.f32 %v278_v4 }
 0x36c   :  { %v279_v7 = vadd.f32 1e-05, %v277_v6 }
 0x36e   :  { %2904 = vrsqrt.f32 %v279_v7 }
 0x374   :  { %v2903_v8 = vpop.eup %2902 }
 0x375   :  { %v282_v10 = vmul.f32 %v2903_v8, %v266_v55 }
 0x378   :  { %v2905_v9 = vpop.eup %2904 }
 0x379   :  { %v283_v11 = vmul.f32 %v2905_v9, %v267_v59 }
 0x37b   :  { %v288_v12 = vpack.c.bf16 %v283_v11, %v282_v10 }
 0x37d   :  { %2623 = vmatmul.mubr.msk.bf16.vlgmr.msra.gmra.mrb[0].mxu1 %vm209_vm1, %v288_v12 }
 0x37e   :  { %2628 = vmatprep.mubr.msk.bf16.mxu1 %vm3028_vm3, %v3027_v0 }
 0x450   :  { %v343_v14 = vpop.f32.mrb[0].mxu1 }
 0x451   :  { %v2624_v15 = vpop.f32.mrb[1].mxu1  ;;  %v344_v17 = vadd.f32 %v2441_v13, %v343_v14 }
 0x452   :  { %v346_v16 = vpop.f32.mrb[2].mxu1 }
 0x453   :  { %v347_v18 = vadd.f32 %v2441_v13, %v346_v16  ;;  %v2625_v19 = vpop.f32.mrb[3].mxu1 }
 0x455   :  { %v3216_v20 = vpack.c.bf16 %v347_v18, %v344_v17 }
 0x457   :  { %356 = vrot.lane.b32.xlu0 %v3216_v20, %s3029_s30 }
 0x45b   :  { %488 = vrot.lane.b32.xlu0 %v3216_v20, %s3030_s0 }
 0x45f   :  { %486 = vrot.lane.b32.xlu0 %v3216_v20, %s3031_s17 }
 0x4c9   :  { %v357_v21 = vpop.permute.xlu0 %356 }
 0x4ca   :  { %v363_v22 = vsel %vm358_vm4, %v357_v21, 0 }
 0x4cb   :  { %2627 = vmatpush3.bf16.xpose.msra.mxu1 %v363_v22 }
 0x4cc   :  { %2632 = vmatprep.subr.bf16.mxu1 %v3027_v0 }
 0x4cd   :  { %v489_v55 = vpop.permute.xlu0 %488 }
 0x4ce   :  { %v494_v57 = vsel %vm358_vm4, %v489_v55, 0 }
 0x4d1   :  { %v487_v58 = vpop.permute.xlu0 %486 }
 0x4d2   :  { %2629 = vmatmul.mubr.msk.bf16.vlgmr.msra.gmra.mrb[4].mxu1 %vm358_vm4, %v3216_v20 }
 0x4d3   :  { %2634 = vmatprep.mubr.msk.bf16.mxu1 %vm3028_vm3, %v3027_v0 }
 0x5a5   :  { %v399_v23 = vpop.f32.mrb[4].mxu1 }
 0x5a6   :  { %v406_v25 = vmul.f32 0.35355338, %v399_v23  ;;  %v2630_v26 = vpop.f32.mrb[5].mxu1 }
 0x5a7   :  { %v402_v27 = vpop.f32.mrb[6].mxu1 }
 0x5a8   :  { %v407_v29 = vmul.f32 0.35355338, %v402_v27  ;;  %v2631_v30 = vpop.f32.mrb[7].mxu1  ;;  %v408_v31 = vadd.f32 %v406_v25, %v3233_v24 }
 0x5a9   :  { %v351_v30 = vld [vmem:[%s3690_s8 + $0x4] sm:$0xf] }
 0x5aa   :  { %v411_v32 = vsel %vm410_vm5, %v408_v31, -inf  ;;  %v409_v33 = vadd.f32 %v407_v29, %v3238_v28 }
 0x5ab   :  { %412 = vmax.xlane.f32.xlu1 %v411_v32 }
 0x5ac   :  { %v415_v34 = vsel %vm414_vm6, %v409_v33, -inf }
 0x5af   :  { %416 = vmax.xlane.f32.xlu1 %v415_v34  ;;  %v619_v34 = vsel %vm617_vm8, %v351_v30, 0 }
 0x638   :  { %v413_v35 = vpop.xlane.xlu1 %412 }
 0x639   :  { %v418_v36 = vsub.f32 %v408_v31, %v413_v35 }
 0x63b   :  { %v420_v37 = vmul.f32 1.442695, %v418_v36  ;;  %v350_v36 = vld [vmem:[%s3690_s8] sm:$0xf] }
 0x63c   :  { %v417_v38 = vpop.xlane.xlu1 %416 }
 0x63d   :  { %2906 = vpow2.f32 %v420_v37  ;;  %v419_v39 = vsub.f32 %v409_v33, %v417_v38 }
 0x63f   :  { %v422_v40 = vmul.f32 1.442695, %v419_v39 }
 0x641   :  { %2908 = vpow2.f32 %v422_v40 }
 0x647   :  { %v2907_v41 = vpop.eup %2906 }
 0x648   :  { %v424_v42 = vsel %vm410_vm5, %v2907_v41, 0.0 }
 0x649   :  { %425 = vadd.xlane.f32.xlu1 %v424_v42 }
 0x64b   :  { %v2909_v43 = vpop.eup %2908 }
 0x64c   :  { %v427_v44 = vsel %vm414_vm6, %v2909_v43, 0.0 }
 0x64d   :  { %428 = vadd.xlane.f32.xlu1 %v427_v44 }
 0x65e   :  { %435 = vrot.lane.b32.xlu1 %v3216_v20, %s3032_s23 }
 0x6d6   :  { %v426_v45 = vpop.xlane.xlu1 %425 }
 0x6d7   :  { %2910 = vrcp.f32 %v426_v45 }
 0x6da   :  { %v429_v46 = vpop.xlane.xlu1 %428 }
 0x6db   :  { %2912 = vrcp.f32 %v429_v46 }
 0x6de   :  { %v436_v48 = vpop.permute.xlu1 %435 }
 0x6df   :  { %v442_v49 = vsel %vm440_vm7, %v436_v48, 0 }
 0x6e0   :  { %2633 = vmatpush3.bf16.msra.mxu1 %v442_v49 }
 0x6e1   :  { %2638 = vmatprep.subr.bf16.mxu1 %v3027_v0  ;;  %v2911_v50 = vpop.eup %2910 }
 0x6e2   :  { %v432_v53 = vmul.f32 %v2911_v50, %v2907_v41  ;;  %v666_v41 = vsel %vm617_vm8, %v350_v36, 0 }
 0x6e5   :  { %v2913_v52 = vpop.eup %2912 }
 0x6e6   :  { %v433_v54 = vmul.f32 %v2913_v52, %v2909_v43 }
 0x6e8   :  { %v434_v56 = vpack.c.bf16 %v433_v54, %v432_v53 }
 0x6ea   :  { %2635 = vmatmul.mubr.msk.bf16.vlgmr.msra.gmra.mrb[8].mxu1 %vm410_vm5, %v434_v56 }
 0x6eb   :  { %2639 = vmatpush3.bf16.xpose.msra.mxu1 %v494_v57  ;;  %2640 = vmatprep.mubr.msk.bf16.mxu1 %vm3028_vm3, %v3027_v0 }
 0x6ec   :  { %2644 = vmatprep.subr.bf16.mxu1 %v3027_v0 }
 0x6f2   :  { %2641 = vmatmul.mubr.msk.bf16.vlgmr.msra.gmra.mrb[12].mxu1 %vm358_vm4, %v487_v58 }
 0x6f3   :  { %2646 = vmatprep.mubr.msk.bf16.mxu1 %vm3028_vm3, %v3027_v0 }
 0x7bd   :  { %v3258_v59 = vpop.f32.mrb[8].mxu1 }
 0x7be   :  { %v2636_v60 = vpop.f32.mrb[9].mxu1 }
 0x7bf   :  { %v3260_v61 = vpop.f32.mrb[10].mxu1 }
 0x7c0   :  { %v485_v62 = vpack.c.bf16 %v3260_v61, %v3258_v59  ;;  %v2637_v63 = vpop.f32.mrb[11].mxu1 }
 0x7c5   :  { %v530_v1 = vpop.f32.mrb[12].mxu1 }
 0x7c6   :  { %v537_v2 = vmul.f32 0.35355338, %v530_v1  ;;  %v2642_v3 = vpop.f32.mrb[13].mxu1 }
 0x7c7   :  { %v533_v4 = vpop.f32.mrb[14].mxu1 }
 0x7c8   :  { %v538_v5 = vmul.f32 0.35355338, %v533_v4  ;;  %v2643_v6 = vpop.f32.mrb[15].mxu1  ;;  %v539_v7 = vadd.f32 %v537_v2, %v3233_v24 }
 0x7ca   :  { %v541_v8 = vsel %vm410_vm5, %v539_v7, -inf  ;;  %v540_v9 = vadd.f32 %v538_v5, %v3238_v28 }
 0x7cb   :  { %542 = vmax.xlane.f32.xlu0 %v541_v8 }
 0x7cc   :  { %v544_v10 = vsel %vm414_vm6, %v540_v9, -inf }
 0x7cd   :  { %545 = vmax.xlane.f32.xlu1 %v544_v10 }
 0x7de   :  { %711 = vrot.lane.b32.xlu1 %v3216_v20, %s3033_s24 }
 0x7e2   :  { %709 = vrot.lane.b32.xlu1 %v3216_v20, %s3034_s1 }
 0x858   :  { %v543_v11 = vpop.xlane.xlu0 %542 }
 0x859   :  { %v547_v12 = vsub.f32 %v539_v7, %v543_v11 }
 0x85a   :  { %v546_v13 = vpop.xlane.xlu1 %545 }
 0x85b   :  { %v549_v14 = vmul.f32 1.442695, %v547_v12  ;;  %v548_v15 = vsub.f32 %v540_v9, %v546_v13 }
 0x85d   :  { %2914 = vpow2.f32 %v549_v14  ;;  %v551_v16 = vmul.f32 1.442695, %v548_v15 }
 0x85e   :  { %v712_v42 = vpop.permute.xlu1 %711 }
 0x85f   :  { %2916 = vpow2.f32 %v551_v16  ;;  %v717_v43 = vsel %vm358_vm4, %v712_v42, 0 }
 0x862   :  { %v710_v44 = vpop.permute.xlu1 %709 }
 0x867   :  { %v2915_v17 = vpop.eup %2914 }
 0x868   :  { %v553_v18 = vsel %vm410_vm5, %v2915_v17, 0.0 }
 0x869   :  { %v2917_v19 = vpop.eup %2916  ;;  %554 = vadd.xlane.f32.xlu0 %v553_v18 }
 0x86a   :  { %v556_v21 = vsel %vm414_vm6, %v2917_v19, 0.0 }
 0x86d   :  { %557 = vadd.xlane.f32.xlu0 %v556_v21 }
 0x883   :  { %564 = vrot.lane.b32.xlu0 %v3216_v20, %s3035_s2 }
 0x8f6   :  { %v555_v22 = vpop.xlane.xlu0 %554 }
 0x8f7   :  { %2918 = vrcp.f32 %v555_v22 }
 0x8fa   :  { %v558_v23 = vpop.xlane.xlu0 %557 }
 0x8fb   :  { %2920 = vrcp.f32 %v558_v23 }
 0x8fe   :  { %v565_v25 = vpop.permute.xlu0 %564 }
 0x8ff   :  { %v570_v26 = vsel %vm440_vm7, %v565_v25, 0 }
 0x900   :  { %2645 = vmatpush3.bf16.msra.mxu1 %v570_v26 }
 0x901   :  { %2650 = vmatprep.subr.bf16.mxu1 %v3027_v0  ;;  %v2919_v27 = vpop.eup %2918 }
 0x902   :  { %v561_v31 = vmul.f32 %v2919_v27, %v2915_v17 }
 0x905   :  { %v2921_v29 = vpop.eup %2920 }
 0x906   :  { %v562_v32 = vmul.f32 %v2921_v29, %v2917_v19  ;;  %v352_v29 = vld [vmem:[%s3690_s8 + $0x8] sm:$0xf] }
 0x907   :  { %v841_v30 = vsel %vm617_vm8, %v352_v29, 0 }
 0x908   :  { %v563_v33 = vpack.c.bf16 %v562_v32, %v561_v31 }
 0x90a   :  { %2647 = vmatmul.mubr.msk.bf16.vlgmr.msra.gmra.mrb[16].mxu1 %vm410_vm5, %v563_v33 }
 0x90b   :  { %2651 = vmatpush3.bf16.msra.mxu1 %v619_v34  ;;  %2652 = vmatprep.mubr.msk.bf16.mxu1 %vm3028_vm3, %v3027_v0 }
 0x90c   :  { %2656 = vmatprep.subr.bf16.mxu1 %v3027_v0 }
 0x9dd   :  { %v606_v35 = vpop.f32.mrb[16].mxu1 }
 0x9de   :  { %v2648_v37 = vpop.f32.mrb[17].mxu1 }
 0x9df   :  { %v609_v38 = vpop.f32.mrb[18].mxu1 }
 0x9e0   :  { %v613_v39 = vpack.c.bf16 %v609_v38, %v606_v35  ;;  %v2649_v40 = vpop.f32.mrb[19].mxu1 }
 0x9e2   :  { %2653 = vmatmul.mubr.msk.bf16.vlgmr.msra.gmra.mrb[20].mxu1 %vm358_vm4, %v613_v39 }
 0x9e3   :  { %2657 = vmatpush3.bf16.msra.mxu1 %v666_v41  ;;  %2658 = vmatprep.mubr.msk.bf16.mxu1 %vm3028_vm3, %v3027_v0 }
 0x9e4   :  { %2662 = vmatprep.subr.bf16.mxu1 %v3027_v0 }
 0x9ea   :  { %2659 = vmatmul.mubr.msk.bf16.vlgmr.msra.gmra.mrb[24].mxu1 %vm358_vm4, %v485_v62 }
 0x9eb   :  { %2664 = vmatprep.mubr.msk.bf16.mxu1 %vm3028_vm3, %v3027_v0 }
 0x9ec   :  { %2663 = vmatpush3.bf16.xpose.msra.mxu1 %v717_v43 }
 0x9ed   :  { %2674 = vmatprep.subr.bf16.mxu1 %v3027_v0 }
 0x9f3   :  { %2665 = vmatmul.mubr.msk.bf16.vlgmr.msra.gmra.mrb[28].mxu1 %vm358_vm4, %v710_v44 }
 0x9f4   :  { %2676 = vmatprep.mubr.msk.bf16.mxu1 %vm3028_vm3, %v3027_v0  ;;  %2675 = vmatpush3.bf16.msra.mxu1 %v841_v30 }
 0x9f5   :  { %2686 = vmatprep.subr.bf16.mxu1 %v3027_v0 }
 0xab5   :  { %v655_v45 = vpop.f32.mrb[20].mxu1 }
 0xab6   :  { %v2654_v46 = vpop.f32.mrb[21].mxu1 }
 0xab7   :  { %v658_v48 = vpop.f32.mrb[22].mxu1 }
 0xab8   :  { %v2655_v49 = vpop.f32.mrb[23].mxu1 }
 0xabd   :  { %v702_v50 = vpop.f32.mrb[24].mxu1 }
 0xabe   :  { %v3305_v52 = vadd.f32 %v702_v50, %v655_v45  ;;  %v2660_v53 = vpop.f32.mrb[25].mxu1 }
 0xabf   :  { %v705_v54 = vpop.f32.mrb[26].mxu1 }
 0xac0   :  { %v3307_v55 = vadd.f32 %v705_v54, %v658_v48  ;;  %v2661_v56 = vpop.f32.mrb[27].mxu1 }
 0xac6   :  { %v753_v57 = vpop.f32.mrb[28].mxu1 }
 0xac7   :  { %v760_v58 = vmul.f32 0.35355338, %v753_v57  ;;  %v2666_v59 = vpop.f32.mrb[29].mxu1 }
 0xac8   :  { %v756_v60 = vpop.f32.mrb[30].mxu1 }
 0xac9   :  { %v761_v61 = vmul.f32 0.35355338, %v756_v60  ;;  %v2667_v62 = vpop.f32.mrb[31].mxu1  ;;  %v762_v63 = vadd.f32 %v760_v58, %v3233_v24  ;;  %v353_v60 = vld [vmem:[%s3690_s8 + $0xc] sm:$0xf] }
 0xacb   :  { %v764_v1 = vsel %vm410_vm5, %v762_v63, -inf  ;;  %v763_v2 = vadd.f32 %v761_v61, %v3238_v28  ;;  %v1018_v61 = vsel %vm617_vm8, %v353_v60, 0  ;;  %v2879_v60 = vld [vmem:[%s3694_s12 + $0x18] sm:$0xff]  }
 0xacc   :  { %765 = vmax.xlane.f32.xlu1 %v764_v1 }
 0xacd   :  { %v767_v3 = vsel %vm414_vm6, %v763_v2, -inf }
 0xace   :  { %768 = vmax.xlane.f32.xlu0 %v767_v3 }
 0xadd   :  { %787 = vrot.lane.b32.xlu1 %v3216_v20, %s3036_s26 }
 0xae1   :  { %886 = vrot.lane.b32.xlu1 %v3216_v20, %s3037_s27 }
 0xb59   :  { %v766_v4 = vpop.xlane.xlu1 %765 }
 0xb5a   :  { %v770_v5 = vsub.f32 %v762_v63, %v766_v4 }
 0xb5b   :  { %v769_v6 = vpop.xlane.xlu0 %768 }
 0xb5c   :  { %v772_v7 = vmul.f32 1.442695, %v770_v5  ;;  %v771_v8 = vsub.f32 %v763_v2, %v769_v6 }
 0xb5d   :  { %v788_v9 = vpop.permute.xlu1 %787 }
 0xb5e   :  { %2922 = vpow2.f32 %v772_v7  ;;  %v774_v10 = vmul.f32 1.442695, %v771_v8  ;;  %v793_v11 = vsel %vm440_vm7, %v788_v9, 0 }
 0xb5f   :  { %2669 = vmatpush3.bf16.msra.mxu0 %v793_v11 }
 0xb60   :  { %2924 = vpow2.f32 %v774_v10  ;;  %2680 = vmatprep.subr.bf16.mxu0 %v3027_v0 }
 0xb61   :  { %v887_v27 = vpop.permute.xlu1 %886 }
 0xb68   :  { %v2923_v12 = vpop.eup %2922 }
 0xb69   :  { %v776_v13 = vsel %vm410_vm5, %v2923_v12, 0.0 }
 0xb6a   :  { %v2925_v14 = vpop.eup %2924  ;;  %777 = vadd.xlane.f32.xlu0 %v776_v13 }
 0xb6b   :  { %v779_v15 = vsel %vm414_vm6, %v2925_v14, 0.0 }
 0xb6e   :  { %780 = vadd.xlane.f32.xlu0 %v779_v15 }
 0xb84   :  { %888 = vrot.lane.b32.xlu0 %v3216_v20, %s3038_s28 }
 0xbf7   :  { %v778_v16 = vpop.xlane.xlu0 %777 }
 0xbf8   :  { %2926 = vrcp.f32 %v778_v16 }
 0xbfb   :  { %v781_v17 = vpop.xlane.xlu0 %780 }
 0xbfc   :  { %2928 = vrcp.f32 %v781_v17 }
 0xbff   :  { %v889_v23 = vpop.permute.xlu0 %888 }
 0xc00   :  { %v894_v26 = vsel %vm358_vm4, %v889_v23, 0 }
 0xc02   :  { %v2927_v18 = vpop.eup %2926 }
 0xc03   :  { %v784_v21 = vmul.f32 %v2927_v18, %v2923_v12 }
 0xc06   :  { %v2929_v19 = vpop.eup %2928 }
 0xc07   :  { %v785_v22 = vmul.f32 %v2929_v19, %v2925_v14  ;;  %v2457_v19 = vld [vmem:[%s3691_s9] ss:$0 sm:$0xff] }
 0xc09   :  { %v786_v25 = vpack.c.bf16 %v785_v22, %v784_v21 }
 0xc0b   :  { %2671 = vmatmul.mubr.msk.bf16.vlgmr.msra.gmra.mrb[4].mxu0 %vm410_vm5, %v786_v25 }
 0xc0c   :  { %2681 = vmatpush3.bf16.xpose.msra.mxu0 %v894_v26  ;;  %2682 = vmatprep.mubr.msk.bf16.mxu0 %vm3028_vm3, %v3027_v0 }
 0xc0d   :  { %2692 = vmatprep.subr.bf16.mxu0 %v3027_v0 }
 0xc13   :  { %2683 = vmatmul.mubr.msk.bf16.vlgmr.msra.gmra.mrb[8].mxu0 %vm358_vm4, %v887_v27 }
 0xc14   :  { %2694 = vmatprep.mubr.msk.bf16.mxu0 %vm3028_vm3, %v3027_v0  ;;  %2693 = vmatpush3.bf16.msra.mxu0 %v1018_v61  ;;  %v2880_v61 = vld [vmem:[%s3694_s12 + $0x20] sm:$0xff]  }
 0xc15   :  { %2706 = vmatprep.subr.bf16.mxu0 %v3027_v0 }
 0xcde   :  { %v829_v31 = vpop.f32.mrb[4].mxu0 }
 0xcdf   :  { %v2672_v32 = vpop.f32.mrb[5].mxu0 }
 0xce0   :  { %v832_v33 = vpop.f32.mrb[6].mxu0 }
 0xce1   :  { %v836_v34 = vpack.c.bf16 %v832_v33, %v829_v31  ;;  %v2673_v35 = vpop.f32.mrb[7].mxu0 }
 0xce3   :  { %2677 = vmatmul.mubr.msk.bf16.vlgmr.msra.gmra.mrb[32].mxu1 %vm358_vm4, %v836_v34 }
 0xce4   :  { %2688 = vmatprep.mubr.msk.bf16.mxu1 %vm3028_vm3, %v3027_v0 }
 0xce6   :  { %v930_v36 = vpop.f32.mrb[8].mxu0 }
 0xce7   :  { %v937_v37 = vmul.f32 0.35355338, %v930_v36  ;;  %v2684_v38 = vpop.f32.mrb[9].mxu0 }
 0xce8   :  { %v933_v39 = vpop.f32.mrb[10].mxu0 }
 0xce9   :  { %v938_v40 = vmul.f32 0.35355338, %v933_v39  ;;  %v2685_v41 = vpop.f32.mrb[11].mxu0  ;;  %v939_v42 = vadd.f32 %v937_v37, %v3233_v24 }
 0xcea   :  { %v2875_v41 = vld [vmem:[%s3692_s10 + $0x8] sm:$0xff]  }
 0xceb   :  { %v941_v43 = vsel %vm410_vm5, %v939_v42, -inf  ;;  %v940_v44 = vadd.f32 %v938_v40, %v3238_v28  ;;  %v2874_v40 = vld [vmem:[%s3692_s10] sm:$0xff]  }
 0xcec   :  { %942 = vmax.xlane.f32.xlu1 %v941_v43 }
 0xced   :  { %v944_v45 = vsel %vm414_vm6, %v940_v44, -inf }
 0xcee   :  { %945 = vmax.xlane.f32.xlu0 %v944_v45 }
 0xd79   :  { %v943_v46 = vpop.xlane.xlu1 %942 }
 0xd7a   :  { %v947_v48 = vsub.f32 %v939_v42, %v943_v46 }
 0xd7b   :  { %v946_v49 = vpop.xlane.xlu0 %945 }
 0xd7c   :  { %v949_v50 = vmul.f32 1.442695, %v947_v48  ;;  %v948_v53 = vsub.f32 %v940_v44, %v946_v49 }
 0xd7e   :  { %2930 = vpow2.f32 %v949_v50  ;;  %v951_v54 = vmul.f32 1.442695, %v948_v53 }
 0xd80   :  { %2932 = vpow2.f32 %v951_v54 }
 0xd88   :  { %v2931_v56 = vpop.eup %2930 }
 0xd89   :  { %v953_v57 = vsel %vm410_vm5, %v2931_v56, 0.0 }
 0xd8a   :  { %v2933_v58 = vpop.eup %2932  ;;  %954 = vadd.xlane.f32.xlu0 %v953_v57  ;;  %v2876_v57 = vld [vmem:[%s3694_s12] sm:$0xff]  }
 0xd8b   :  { %v956_v59 = vsel %vm414_vm6, %v2933_v58, 0.0 }
 0xd8c   :  { %957 = vadd.xlane.f32.xlu1 %v956_v59  ;;  %v2878_v59 = vld [vmem:[%s3694_s12 + $0x10] sm:$0xff]  }
 0xda0   :  { %964 = vrot.lane.b32.xlu0 %v3216_v20, %s3039_s20 }
 0xdb6   :  { %v877_v62 = vpop.f32.mrb[32].mxu1 }
 0xdb7   :  { %v884_v63 = vadd.f32 %v877_v62, %v3305_v52  ;;  %v2678_v1 = vpop.f32.mrb[33].mxu1  ;;  %v2881_v62 = vld [vmem:[%s3694_s12 + $0x28] sm:$0xff]  }
 0xdb8   :  { %v880_v2 = vpop.f32.mrb[34].mxu1  ;;  %v2883_v1 = vld [vmem:[%s3694_s12 + $0x38] sm:$0xff]  }
 0xdb9   :  { %v885_v3 = vadd.f32 %v880_v2, %v3307_v55  ;;  %v2679_v4 = vpop.f32.mrb[35].mxu1  ;;  %v2458_v2 = vld [vmem:[%s3693_s11] ss:$0 sm:$0xff] }
 0xe17   :  { %v955_v5 = vpop.xlane.xlu0 %954 }
 0xe18   :  { %2934 = vrcp.f32 %v955_v5 }
 0xe19   :  { %v958_v20 = vpop.xlane.xlu1 %957 }
 0xe1a   :  { %2936 = vrcp.f32 %v958_v20 }
 0xe1b   :  { %v965_v6 = vpop.permute.xlu0 %964 }
 0xe1c   :  { %v970_v7 = vsel %vm440_vm7, %v965_v6, 0 }
 0xe1d   :  { %2687 = vmatpush3.bf16.msra.mxu1 %v970_v7 }
 0xe1e   :  { %2698 = vmatprep.subr.bf16.mxu1 %v3027_v0 }
 0xe22   :  { %v2935_v8 = vpop.eup %2934 }
 0xe23   :  { %v961_v10 = vmul.f32 %v2935_v8, %v2931_v56 }
 0xe24   :  { %v2937_v9 = vpop.eup %2936 }
 0xe25   :  { %v962_v11 = vmul.f32 %v2937_v9, %v2933_v58  ;;  %v2877_v58 = vld [vmem:[%s3694_s12 + $0x8] sm:$0xff]  }
 0xe27   :  { %v963_v52 = vpack.c.bf16 %v962_v11, %v961_v10 }
 0xe29   :  { %2689 = vmatmul.mubr.msk.bf16.vlgmr.msra.gmra.mrb[36].mxu1 %vm410_vm5, %v963_v52 }
 0xe2a   :  { %2702 = vmatprep.mubr.msk.bf16.mxu1 %vm3028_vm3, %v3027_v0  ;;  %2699 = vmatpush3.bf16.msra.mxu1 %v2874_v40 }
 0xe2b   :  { %2700 = vmatprep.subr.bf16.mxu1 %v3027_v0 }
 0xe2e   :  { %2701 = vmatpush3.bf16.msra.mxu1 %v2875_v41  ;;  %v2884_v41 = vld [vmem:[%s3688_s6 + $0x10] sm:$0xff]  }
 0xe2f   :  { %2726 = vmatprep.subr.bf16.mxu1 %v3027_v0 }
 0xefc   :  { %v1006_v55 = vpop.f32.mrb[36].mxu1 }
 0xefd   :  { %v2690_v12 = vpop.f32.mrb[37].mxu1 }
 0xefe   :  { %v1009_v13 = vpop.f32.mrb[38].mxu1 }
 0xeff   :  { %v1013_v14 = vpack.c.bf16 %v1009_v13, %v1006_v55  ;;  %v2691_v15 = vpop.f32.mrb[39].mxu1 }
 0xf01   :  { %2695 = vmatmul.mubr.msk.bf16.vlgmr.msra.gmra.mrb[12].mxu0 %vm358_vm4, %v1013_v14 }
 0xf02   :  { %2722 = vmatprep.mubr.msk.bf16.mxu0 %vm3028_vm3, %v3027_v0  ;;  %2707 = vmatpush3.bf16.msra.mxu0 %v2876_v57 }
 0xf03   :  { %2708 = vmatprep.subr.bf16.mxu0 %v3027_v0 }
 0xf06   :  { %2709 = vmatpush3.bf16.msra.mxu0 %v2877_v58  ;;  %v2477_v58 = vld [vmem:[%s3689_s7 + $0x1] ss:$0 sm:$0xff] }
 0xf07   :  { %2710 = vmatprep.subr.bf16.mxu0 %v3027_v0 }
 0xf0a   :  { %2711 = vmatpush3.bf16.msra.mxu0 %v2878_v59 }
 0xf0b   :  { %2712 = vmatprep.subr.bf16.mxu0 %v3027_v0 }
 0xf0e   :  { %2713 = vmatpush3.bf16.msra.mxu0 %v2879_v60 }
 0xf0f   :  { %2714 = vmatprep.subr.bf16.mxu0 %v3027_v0 }
 0xf12   :  { %2715 = vmatpush3.bf16.msra.mxu0 %v2880_v61 }
 0xf13   :  { %2716 = vmatprep.subr.bf16.mxu0 %v3027_v0 }
 0xf16   :  { %2717 = vmatpush3.bf16.msra.mxu0 %v2881_v62 }
 0xf17   :  { %2718 = vmatprep.subr.bf16.mxu0 %v3027_v0 }
 0xfd4   :  { %v1054_v16 = vpop.f32.mrb[12].mxu0 }
 0xfd5   :  { %v1061_v17 = vadd.f32 %v1054_v16, %v884_v63  ;;  %v2696_v18 = vpop.f32.mrb[13].mxu0  ;;  %v2882_v63 = vld [vmem:[%s3694_s12 + $0x30] sm:$0xff]  }
 0xfd6   :  { %v1057_v21 = vpop.f32.mrb[14].mxu0  ;;  %2719 = vmatpush3.bf16.msra.mxu0 %v2882_v63 }
 0xfd7   :  { %v1063_v22 = vadd.f32 %v1061_v17, %v3184_v47  ;;  %v1062_v23 = vadd.f32 %v1057_v21, %v885_v3  ;;  %v2697_v25 = vpop.f32.mrb[15].mxu0  ;;  %2720 = vmatprep.subr.bf16.mxu0 %v3027_v0  ;;  %v2472_v21 = vld [vmem:[%s3695_s13] ss:$0 sm:$0xff] }
 0xfd9   :  { %v3366_v26 = vadd.f32 %v2457_v19, %v1063_v22  ;;  %v1064_v27 = vadd.f32 %v1062_v23, %v3188_v51 }
 0xfda   :  { %2721 = vmatpush3.bf16.msra.mxu0 %v2883_v1 }
 0xfdb   :  { %v3369_v29 = vadd.f32 %v2457_v19, %v1064_v27  ;;  %v1072_v30 = vsel %vm209_vm1, %v3366_v26, 0.0  ;;  %2752 = vmatprep.subr.bf16.mxu0 %v3027_v0 }
 0xfdc   :  { %1073 = vadd.xlane.f32.xlu1 %v1072_v30 }
 0xfdd   :  { %v1075_v31 = vsel %vm213_vm2, %v3369_v29, 0.0 }
 0xfe0   :  { %1076 = vadd.xlane.f32.xlu1 %v1075_v31 }
0x1069   :  { %v1074_v32 = vpop.xlane.xlu1 %1073 }
0x106a   :  { %v1078_v33 = vmul.f32 0.03125, %v1074_v32 }
0x106c   :  { %v1080_v47 = vsub.f32 %v3366_v26, %v1078_v33 }
0x106d   :  { %v1077_v34 = vpop.xlane.xlu1 %1076 }
0x106e   :  { %v1079_v35 = vmul.f32 0.03125, %v1077_v34  ;;  %v1082_v36 = vmul.f32 %v1080_v47, %v1080_v47 }
0x1070   :  { %v1081_v37 = vsub.f32 %v3369_v29, %v1079_v35  ;;  %v1084_v51 = vsel %vm209_vm1, %v1082_v36, 0.0 }
0x1071   :  { %1085 = vadd.xlane.f32.xlu1 %v1084_v51 }
0x1072   :  { %v1083_v38 = vmul.f32 %v1081_v37, %v1081_v37 }
0x1074   :  { %v1087_v39 = vsel %vm213_vm2, %v1083_v38, 0.0 }
0x1075   :  { %1088 = vadd.xlane.f32.xlu1 %v1087_v39 }
0x10fe   :  { %v1086_v42 = vpop.xlane.xlu1 %1085 }
0x10ff   :  { %v1090_v43 = vmul.f32 0.03125, %v1086_v42  ;;  %v2885_v42 = vld [vmem:[%s3688_s6 + $0x18] sm:$0xff]  }
0x1101   :  { %v1092_v44 = vadd.f32 1e-05, %v1090_v43 }
0x1102   :  { %v1089_v45 = vpop.xlane.xlu1 %1088 }
0x1103   :  { %v1091_v46 = vmul.f32 0.03125, %v1089_v45  ;;  %2938 = vrsqrt.f32 %v1092_v44 }
0x1105   :  { %v1093_v48 = vadd.f32 1e-05, %v1091_v46 }
0x1107   :  { %2940 = vrsqrt.f32 %v1093_v48 }
0x110d   :  { %v2939_v49 = vpop.eup %2938 }
0x110e   :  { %v1096_v53 = vmul.f32 %v2939_v49, %v1080_v47 }
0x1111   :  { %v2941_v50 = vpop.eup %2940 }
0x1112   :  { %v1097_v54 = vmul.f32 %v2941_v50, %v1081_v37 }
0x1114   :  { %v1102_v56 = vpack.c.bf16 %v1097_v54, %v1096_v53 }
0x1116   :  { %2703 = vmatmul.mubr.msk.bf16.vlgmr.msra.gmra.mrb[40].mxu1 %vm209_vm1, %v1102_v56 }
0x1117   :  { %2730 = vmatprep.mubr.msk.bf16.mxu1 %vm3028_vm3, %v3027_v0  ;;  %2727 = vmatpush3.bf16.msra.mxu1 %v2884_v41 }
0x1118   :  { %2728 = vmatprep.subr.bf16.mxu1 %v3027_v0 }
0x111b   :  { %2729 = vmatpush3.bf16.msra.mxu1 %v2885_v42 }
0x111c   :  { %2734 = vmatprep.subr.bf16.mxu1 %v3027_v0 }
0x11e9   :  { %v1157_v3 = vpop.f32.mrb[40].mxu1 }
0x11ea   :  { %v1158_v4 = vadd.f32 %v2458_v2, %v1157_v3  ;;  %v2704_v5 = vpop.f32.mrb[41].mxu1 }
0x11eb   :  { %v1160_v20 = vpop.f32.mrb[42].mxu1 }
0x11ec   :  { %v2462_v6 = vmul.f32 -1.702, %v1158_v4  ;;  %v1161_v7 = vadd.f32 %v2458_v2, %v1160_v20  ;;  %v2705_v8 = vpop.f32.mrb[43].mxu1 }
0x11ee   :  { %v1168_v9 = vmul.f32 1.442695, %v2462_v6  ;;  %v2463_v10 = vmul.f32 -1.702, %v1161_v7 }
0x11f0   :  { %2942 = vpow2.f32 %v1168_v9  ;;  %v1170_v11 = vmul.f32 1.442695, %v2463_v10 }
0x11f2   :  { %2944 = vpow2.f32 %v1170_v11 }
0x11fa   :  { %v2943_v52 = vpop.eup %2942 }
0x11fb   :  { %v1172_v55 = vadd.f32 1.0, %v2943_v52 }
0x11fc   :  { %v2945_v12 = vpop.eup %2944 }
0x11fd   :  { %2946 = vrcp.f32 %v1172_v55  ;;  %v1173_v13 = vadd.f32 1.0, %v2945_v12 }
0x11ff   :  { %2948 = vrcp.f32 %v1173_v13 }
0x1207   :  { %v2947_v14 = vpop.eup %2946 }
0x1208   :  { %v1178_v16 = vmul.f32 %v2947_v14, %v1158_v4 }
0x1209   :  { %v2949_v15 = vpop.eup %2948 }
0x120a   :  { %v1179_v17 = vmul.f32 %v2949_v15, %v1161_v7 }
0x120c   :  { %v1196_v18 = vpack.c.bf16 %v1179_v17, %v1178_v16 }
0x120e   :  { %2723 = vmatmul.mubr.bf16.vlgmr.msra.gmra.mrb[16].mxu0 %v1196_v18 }
0x120f   :  { %2754 = vmatprep.mubr.msk.bf16.mxu0 %vm3028_vm3, %v3027_v0 }
0x12e1   :  { %v1279_v19 = vpop.f32.mrb[16].mxu0 }
0x12e2   :  { %v1286_v22 = vadd.f32 %v1279_v19, %v3366_v26  ;;  %v2724_v23 = vpop.f32.mrb[17].mxu0 }
0x12e3   :  { %v1282_v25 = vpop.f32.mrb[18].mxu0 }
0x12e4   :  { %v3431_v27 = vadd.f32 %v2472_v21, %v1286_v22  ;;  %v1287_v30 = vadd.f32 %v1282_v25, %v3369_v29  ;;  %v2725_v31 = vpop.f32.mrb[19].mxu0 }
0x12e6   :  { %v3434_v32 = vadd.f32 %v2472_v21, %v1287_v30  ;;  %v1295_v33 = vsel %vm209_vm1, %v3431_v27, 0.0 }
0x12e7   :  { %1296 = vadd.xlane.f32.xlu1 %v1295_v33 }
0x12e8   :  { %v1298_v47 = vsel %vm213_vm2, %v3434_v32, 0.0 }
0x12eb   :  { %1299 = vadd.xlane.f32.xlu1 %v1298_v47 }
0x1374   :  { %v1297_v34 = vpop.xlane.xlu1 %1296 }
0x1375   :  { %v1301_v35 = vmul.f32 0.03125, %v1297_v34 }
0x1377   :  { %v1303_v26 = vsub.f32 %v3431_v27, %v1301_v35 }
0x1378   :  { %v1300_v36 = vpop.xlane.xlu1 %1299 }
0x1379   :  { %v1302_v37 = vmul.f32 0.03125, %v1300_v36  ;;  %v1305_v51 = vmul.f32 %v1303_v26, %v1303_v26 }
0x137b   :  { %v1304_v29 = vsub.f32 %v3434_v32, %v1302_v37  ;;  %v1307_v38 = vsel %vm209_vm1, %v1305_v51, 0.0 }
0x137c   :  { %1308 = vadd.xlane.f32.xlu0 %v1307_v38 }
0x137d   :  { %v1306_v39 = vmul.f32 %v1304_v29, %v1304_v29 }
0x137f   :  { %v1310_v40 = vsel %vm213_vm2, %v1306_v39, 0.0 }
0x1380   :  { %1311 = vadd.xlane.f32.xlu1 %v1310_v40 }
0x1409   :  { %v1309_v43 = vpop.xlane.xlu0 %1308 }
0x140a   :  { %v1313_v44 = vmul.f32 0.03125, %v1309_v43 }
0x140c   :  { %v1315_v45 = vadd.f32 1e-05, %v1313_v44 }
0x140d   :  { %v1312_v46 = vpop.xlane.xlu1 %1311 }
0x140e   :  { %v1314_v48 = vmul.f32 0.03125, %v1312_v46  ;;  %2950 = vrsqrt.f32 %v1315_v45 }
0x1410   :  { %v1316_v49 = vadd.f32 1e-05, %v1314_v48 }
0x1412   :  { %2952 = vrsqrt.f32 %v1316_v49 }
0x1418   :  { %v2951_v50 = vpop.eup %2950 }
0x1419   :  { %v1319_v54 = vmul.f32 %v2951_v50, %v1303_v26 }
0x141c   :  { %v2953_v53 = vpop.eup %2952 }
0x141d   :  { %v1320_v56 = vmul.f32 %v2953_v53, %v1304_v29 }
0x141f   :  { %v1326_v57 = vpack.c.bf16 %v1320_v56, %v1319_v54 }
0x1421   :  { %2731 = vmatmul.mubr.msk.bf16.vlgmr.msra.gmra.mrb[44].mxu1 %vm209_vm1, %v1326_v57 }
0x1422   :  { %2736 = vmatprep.mubr.msk.bf16.mxu1 %vm3028_vm3, %v3027_v0 }
0x14f4   :  { %v1381_v59 = vpop.f32.mrb[44].mxu1 }
0x14f5   :  { %v2732_v60 = vpop.f32.mrb[45].mxu1  ;;  %v1382_v62 = vadd.f32 %v2477_v58, %v1381_v59 }
0x14f6   :  { %v1384_v61 = vpop.f32.mrb[46].mxu1 }
0x14f7   :  { %v1385_v63 = vadd.f32 %v2477_v58, %v1384_v61  ;;  %v2733_v1 = vpop.f32.mrb[47].mxu1 }
0x14f8   :  { %v2482_v1 = vld [vmem:[%s3690_s8 + $0x14] sm:$0xf] }
0x14f9   :  { %v3458_v2 = vpack.c.bf16 %v1385_v63, %v1382_v62 }
0x14fb   :  { %1395 = vrot.lane.b32.xlu1 %v3458_v2, %s3029_s30 }
0x156d   :  { %v1396_v3 = vpop.permute.xlu1 %1395 }
0x156e   :  { %v1401_v4 = vsel %vm358_vm4, %v1396_v3, 0  ;;  %v1653_v3 = vsel %vm617_vm8, %v2482_v1, 0 }
0x156f   :  { %2735 = vmatpush3.bf16.xpose.msra.mxu1 %v1401_v4 }
0x1570   :  { %2740 = vmatprep.subr.bf16.mxu1 %v3027_v0 }
0x1576   :  { %2737 = vmatmul.mubr.msk.bf16.vlgmr.msra.gmra.mrb[48].mxu1 %vm358_vm4, %v3458_v2 }
0x1577   :  { %2742 = vmatprep.mubr.msk.bf16.mxu1 %vm3028_vm3, %v3027_v0 }
0x1649   :  { %v1437_v5 = vpop.f32.mrb[48].mxu1 }
0x164a   :  { %v1444_v20 = vmul.f32 0.35355338, %v1437_v5  ;;  %v2738_v6 = vpop.f32.mrb[49].mxu1 }
0x164b   :  { %v1440_v7 = vpop.f32.mrb[50].mxu1 }
0x164c   :  { %v1445_v8 = vmul.f32 0.35355338, %v1440_v7  ;;  %v2739_v9 = vpop.f32.mrb[51].mxu1  ;;  %v1446_v10 = vadd.f32 %v1444_v20, %v3233_v24 }
0x164d   :  { %v2481_v9 = vld [vmem:[%s3690_s8 + $0x10] sm:$0xf] }
0x164e   :  { %v1448_v11 = vsel %vm410_vm5, %v1446_v10, -inf  ;;  %v1447_v52 = vadd.f32 %v1445_v8, %v3238_v28 }
0x164f   :  { %1449 = vmax.xlane.f32.xlu1 %v1448_v11 }
0x1650   :  { %v1451_v55 = vsel %vm414_vm6, %v1447_v52, -inf }
0x1651   :  { %1452 = vmax.xlane.f32.xlu0 %v1451_v55  ;;  %v1700_v55 = vsel %vm617_vm8, %v2481_v9, 0 }
0x1660   :  { %1523 = vrot.lane.b32.xlu1 %v3458_v2, %s3030_s0 }
0x16dc   :  { %v1450_v12 = vpop.xlane.xlu1 %1449 }
0x16dd   :  { %v1454_v13 = vsub.f32 %v1446_v10, %v1450_v12 }
0x16de   :  { %v1453_v14 = vpop.xlane.xlu0 %1452 }
0x16df   :  { %v1456_v15 = vmul.f32 1.442695, %v1454_v13  ;;  %v1455_v16 = vsub.f32 %v1447_v52, %v1453_v14 }
0x16e0   :  { %v1524_v26 = vpop.permute.xlu1 %1523 }
0x16e1   :  { %2954 = vpow2.f32 %v1456_v15  ;;  %v1458_v17 = vmul.f32 1.442695, %v1455_v16  ;;  %v1529_v37 = vsel %vm358_vm4, %v1524_v26, 0 }
0x16e3   :  { %2956 = vpow2.f32 %v1458_v17 }
0x16eb   :  { %v2955_v18 = vpop.eup %2954 }
0x16ec   :  { %v1460_v19 = vsel %vm410_vm5, %v2955_v18, 0.0 }
0x16ed   :  { %v2957_v21 = vpop.eup %2956  ;;  %1461 = vadd.xlane.f32.xlu0 %v1460_v19 }
0x16ee   :  { %v1463_v22 = vsel %vm414_vm6, %v2957_v21, 0.0 }
0x16f1   :  { %1464 = vadd.xlane.f32.xlu0 %v1463_v22 }
0x1707   :  { %1471 = vrot.lane.b32.xlu0 %v3458_v2, %s3032_s23 }
0x170b   :  { %1521 = vrot.lane.b32.xlu0 %v3458_v2, %s3031_s17 }
0x177a   :  { %v1462_v23 = vpop.xlane.xlu0 %1461 }
0x177b   :  { %2958 = vrcp.f32 %v1462_v23 }
0x177e   :  { %v1465_v25 = vpop.xlane.xlu0 %1464 }
0x177f   :  { %2960 = vrcp.f32 %v1465_v25 }
0x1782   :  { %v1472_v30 = vpop.permute.xlu0 %1471 }
0x1783   :  { %v1477_v31 = vsel %vm440_vm7, %v1472_v30, 0 }
0x1784   :  { %2741 = vmatpush3.bf16.msra.mxu1 %v1477_v31 }
0x1785   :  { %2746 = vmatprep.subr.bf16.mxu1 %v3027_v0  ;;  %v2959_v33 = vpop.eup %2958 }
0x1786   :  { %v1468_v34 = vmul.f32 %v2959_v33, %v2955_v18  ;;  %v1522_v51 = vpop.permute.xlu0 %1521 }
0x1789   :  { %v2961_v47 = vpop.eup %2960 }
0x178a   :  { %v1469_v35 = vmul.f32 %v2961_v47, %v2957_v21 }
0x178c   :  { %v1470_v36 = vpack.c.bf16 %v1469_v35, %v1468_v34 }
0x178e   :  { %2743 = vmatmul.mubr.msk.bf16.vlgmr.msra.gmra.mrb[52].mxu1 %vm410_vm5, %v1470_v36 }
0x178f   :  { %2747 = vmatpush3.bf16.xpose.msra.mxu1 %v1529_v37  ;;  %2748 = vmatprep.mubr.msk.bf16.mxu1 %vm3028_vm3, %v3027_v0 }
0x1790   :  { %2758 = vmatprep.subr.bf16.mxu1 %v3027_v0 }
0x1796   :  { %2749 = vmatmul.mubr.msk.bf16.vlgmr.msra.gmra.mrb[56].mxu1 %vm358_vm4, %v1522_v51 }
0x1797   :  { %2760 = vmatprep.mubr.msk.bf16.mxu1 %vm3028_vm3, %v3027_v0  ;;  %2759 = vmatpush3.bf16.msra.mxu1 %v1653_v3 }
0x1798   :  { %2770 = vmatprep.subr.bf16.mxu1 %v3027_v0 }
0x1861   :  { %v1513_v29 = vpop.f32.mrb[52].mxu1 }
0x1862   :  { %v2744_v38 = vpop.f32.mrb[53].mxu1 }
0x1863   :  { %v1516_v39 = vpop.f32.mrb[54].mxu1 }
0x1864   :  { %v1520_v40 = vpack.c.bf16 %v1516_v39, %v1513_v29  ;;  %v2745_v41 = vpop.f32.mrb[55].mxu1  ;;  %v3535_v39 = vld [vmem:[%s3685_s3] sm:$0xff] }
0x1869   :  { %v1565_v42 = vpop.f32.mrb[56].mxu1 }
0x186a   :  { %v1572_v43 = vmul.f32 0.35355338, %v1565_v42  ;;  %v2750_v44 = vpop.f32.mrb[57].mxu1  ;;  %v3542_v42 = vld [vmem:[%s3685_s3 + $0x8] sm:$0x3] }
0x186b   :  { %v1568_v45 = vpop.f32.mrb[58].mxu1 }
0x186c   :  { %v1573_v46 = vmul.f32 0.35355338, %v1568_v45  ;;  %v2751_v48 = vpop.f32.mrb[59].mxu1  ;;  %v1574_v49 = vadd.f32 %v1572_v43, %v3233_v24 }
0x186e   :  { %v1576_v50 = vsel %vm410_vm5, %v1574_v49, -inf  ;;  %v1575_v53 = vadd.f32 %v1573_v46, %v3238_v28 }
0x186f   :  { %1577 = vmax.xlane.f32.xlu0 %v1576_v50 }
0x1870   :  { %v1579_v54 = vsel %vm414_vm6, %v1575_v53, -inf }
0x1871   :  { %1580 = vmax.xlane.f32.xlu1 %v1579_v54 }
0x1882   :  { %1745 = vrot.lane.b32.xlu1 %v3458_v2, %s3033_s24 }
0x1886   :  { %1743 = vrot.lane.b32.xlu1 %v3458_v2, %s3034_s1 }
0x18fc   :  { %v1578_v56 = vpop.xlane.xlu0 %1577 }
0x18fd   :  { %v1582_v57 = vsub.f32 %v1574_v49, %v1578_v56 }
0x18fe   :  { %v1581_v58 = vpop.xlane.xlu1 %1580 }
0x18ff   :  { %v1584_v59 = vmul.f32 1.442695, %v1582_v57  ;;  %v1583_v60 = vsub.f32 %v1575_v53, %v1581_v58 }
0x1901   :  { %2962 = vpow2.f32 %v1584_v59  ;;  %v1586_v24 = vmul.f32 1.442695, %v1583_v60 }
0x1902   :  { %v1746_v14 = vpop.permute.xlu1 %1745 }
0x1903   :  { %2964 = vpow2.f32 %v1586_v24  ;;  %v1751_v18 = vsel %vm358_vm4, %v1746_v14, 0 }
0x1906   :  { %v1744_v25 = vpop.permute.xlu1 %1743 }
0x190b   :  { %v2963_v61 = vpop.eup %2962 }
0x190c   :  { %v1588_v28 = vsel %vm410_vm5, %v2963_v61, 0.0 }
0x190d   :  { %v2965_v62 = vpop.eup %2964  ;;  %1589 = vadd.xlane.f32.xlu0 %v1588_v28 }
0x190e   :  { %v1591_v63 = vsel %vm414_vm6, %v2965_v62, 0.0 }
0x1911   :  { %1592 = vadd.xlane.f32.xlu0 %v1591_v63 }
0x1927   :  { %1599 = vrot.lane.b32.xlu0 %v3458_v2, %s3035_s2 }
0x199a   :  { %v1590_v4 = vpop.xlane.xlu0 %1589 }
0x199b   :  { %2966 = vrcp.f32 %v1590_v4 }
0x199e   :  { %v1593_v5 = vpop.xlane.xlu0 %1592 }
0x199f   :  { %2968 = vrcp.f32 %v1593_v5 }
0x19a2   :  { %v1600_v20 = vpop.permute.xlu0 %1599 }
0x19a3   :  { %v1605_v6 = vsel %vm440_vm7, %v1600_v20, 0 }
0x19a4   :  { %2753 = vmatpush3.bf16.msra.mxu0 %v1605_v6  ;;  %v2483_v6 = vld [vmem:[%s3690_s8 + $0x18] sm:$0xf] }
0x19a5   :  { %2764 = vmatprep.subr.bf16.mxu0 %v3027_v0  ;;  %v2967_v7 = vpop.eup %2966 }
0x19a6   :  { %v1596_v10 = vmul.f32 %v2967_v7, %v2963_v61  ;;  %v1875_v7 = vsel %vm617_vm8, %v2483_v6, 0 }
0x19a9   :  { %v2969_v8 = vpop.eup %2968 }
0x19aa   :  { %v1597_v11 = vmul.f32 %v2969_v8, %v2965_v62 }
0x19ac   :  { %v1598_v52 = vpack.c.bf16 %v1597_v11, %v1596_v10 }
0x19ae   :  { %2755 = vmatmul.mubr.msk.bf16.vlgmr.msra.gmra.mrb[20].mxu0 %vm410_vm5, %v1598_v52 }
0x19af   :  { %2765 = vmatpush3.bf16.msra.mxu0 %v1700_v55  ;;  %2766 = vmatprep.mubr.msk.bf16.mxu0 %vm3028_vm3, %v3027_v0 }
0x19b0   :  { %2776 = vmatprep.subr.bf16.mxu0 %v3027_v0 }
0x19b6   :  { %2767 = vmatmul.mubr.msk.bf16.vlgmr.msra.gmra.mrb[24].mxu0 %vm358_vm4, %v1520_v40 }
0x19b7   :  { %2778 = vmatprep.mubr.msk.bf16.mxu0 %vm3028_vm3, %v3027_v0 }
0x1a81   :  { %v1641_v12 = vpop.f32.mrb[20].mxu0 }
0x1a82   :  { %v2756_v13 = vpop.f32.mrb[21].mxu0 }
0x1a83   :  { %v1644_v15 = vpop.f32.mrb[22].mxu0 }
0x1a84   :  { %v1648_v16 = vpack.c.bf16 %v1644_v15, %v1641_v12  ;;  %v2757_v17 = vpop.f32.mrb[23].mxu0 }
0x1a86   :  { %2761 = vmatmul.mubr.msk.bf16.vlgmr.msra.gmra.mrb[60].mxu1 %vm358_vm4, %v1648_v16 }
0x1a87   :  { %2771 = vmatpush3.bf16.xpose.msra.mxu1 %v1751_v18  ;;  %2772 = vmatprep.mubr.msk.bf16.mxu1 %vm3028_vm3, %v3027_v0 }
0x1a88   :  { %2782 = vmatprep.subr.bf16.mxu1 %v3027_v0 }
0x1a89   :  { %v1736_v19 = vpop.f32.mrb[24].mxu0 }
0x1a8a   :  { %v2768_v21 = vpop.f32.mrb[25].mxu0 }
0x1a8b   :  { %v1739_v22 = vpop.f32.mrb[26].mxu0 }
0x1a8c   :  { %v2769_v23 = vpop.f32.mrb[27].mxu0 }
0x1a8e   :  { %2773 = vmatmul.mubr.msk.bf16.vlgmr.msra.gmra.mrb[64].mxu1 %vm358_vm4, %v1744_v25 }
0x1a8f   :  { %2784 = vmatprep.mubr.msk.bf16.mxu1 %vm3028_vm3, %v3027_v0  ;;  %2783 = vmatpush3.bf16.msra.mxu1 %v1875_v7 }
0x1a90   :  { %2794 = vmatprep.subr.bf16.mxu1 %v3027_v0 }
0x1b59   :  { %v1689_v30 = vpop.f32.mrb[60].mxu1 }
0x1b5a   :  { %v3528_v31 = vadd.f32 %v1736_v19, %v1689_v30  ;;  %v2762_v33 = vpop.f32.mrb[61].mxu1 }
0x1b5b   :  { %v1692_v47 = vpop.f32.mrb[62].mxu1 }
0x1b5c   :  { %v3530_v34 = vadd.f32 %v1739_v22, %v1692_v47  ;;  %v2763_v35 = vpop.f32.mrb[63].mxu1 }
0x1b61   :  { %v1787_v26 = vpop.f32.mrb[64].mxu1 }
0x1b62   :  { %v1794_v36 = vmul.f32 0.35355338, %v1787_v26  ;;  %v2774_v37 = vpop.f32.mrb[65].mxu1 }
0x1b63   :  { %v1790_v51 = vpop.f32.mrb[66].mxu1 }
0x1b64   :  { %v1795_v29 = vmul.f32 0.35355338, %v1790_v51  ;;  %v2775_v38 = vpop.f32.mrb[67].mxu1  ;;  %v1796_v40 = vadd.f32 %v3535_v39, %v1794_v36 }
0x1b66   :  { %v1798_v41 = vsel %vm410_vm5, %v1796_v40, -inf  ;;  %v1797_v43 = vadd.f32 %v3542_v42, %v1795_v29  ;;  %v2484_v29 = vld [vmem:[%s3690_s8 + $0x1c] sm:$0xf] }
0x1b67   :  { %1799 = vmax.xlane.f32.xlu0 %v1798_v41  ;;  %v2052_v38 = vsel %vm617_vm8, %v2484_v29, 0  ;;  %v2895_v29 = vld [vmem:[%s3694_s12 + $0x78] sm:$0xff]  }
0x1b68   :  { %v1801_v44 = vsel %vm414_vm6, %v1797_v43, -inf }
0x1b69   :  { %1802 = vmax.xlane.f32.xlu1 %v1801_v44 }
0x1b7a   :  { %1922 = vrot.lane.b32.xlu1 %v3458_v2, %s3038_s28 }
0x1b7e   :  { %1920 = vrot.lane.b32.xlu1 %v3458_v2, %s3037_s27 }
0x1bf4   :  { %v1800_v45 = vpop.xlane.xlu0 %1799 }
0x1bf5   :  { %v1804_v46 = vsub.f32 %v1796_v40, %v1800_v45 }
0x1bf6   :  { %v1803_v48 = vpop.xlane.xlu1 %1802 }
0x1bf7   :  { %v1806_v49 = vmul.f32 1.442695, %v1804_v46  ;;  %v1805_v50 = vsub.f32 %v1797_v43, %v1803_v48 }
0x1bf9   :  { %2970 = vpow2.f32 %v1806_v49  ;;  %v1808_v53 = vmul.f32 1.442695, %v1805_v50 }
0x1bfa   :  { %v1923_v3 = vpop.permute.xlu1 %1922 }
0x1bfb   :  { %2972 = vpow2.f32 %v1808_v53  ;;  %v1928_v5 = vsel %vm358_vm4, %v1923_v3, 0 }
0x1bfe   :  { %v1921_v20 = vpop.permute.xlu1 %1920 }
0x1c03   :  { %v2971_v54 = vpop.eup %2970 }
0x1c04   :  { %v1810_v56 = vsel %vm410_vm5, %v2971_v54, 0.0 }
0x1c05   :  { %v2973_v57 = vpop.eup %2972  ;;  %1811 = vadd.xlane.f32.xlu0 %v1810_v56 }
0x1c06   :  { %v1813_v58 = vsel %vm414_vm6, %v2973_v57, 0.0 }
0x1c09   :  { %1814 = vadd.xlane.f32.xlu0 %v1813_v58 }
0x1c1f   :  { %1821 = vrot.lane.b32.xlu0 %v3458_v2, %s3036_s26 }
0x1c92   :  { %v1812_v59 = vpop.xlane.xlu0 %1811 }
0x1c93   :  { %2974 = vrcp.f32 %v1812_v59 }
0x1c96   :  { %v1815_v60 = vpop.xlane.xlu0 %1814 }
0x1c97   :  { %2976 = vrcp.f32 %v1815_v60 }
0x1c9a   :  { %v1822_v24 = vpop.permute.xlu0 %1821 }
0x1c9b   :  { %v1827_v61 = vsel %vm440_vm7, %v1822_v24, 0 }
0x1c9c   :  { %2777 = vmatpush3.bf16.msra.mxu0 %v1827_v61  ;;  %v2497_v61 = vld [vmem:[%s3691_s9 + $0x1] ss:$0 sm:$0xff] }
0x1c9d   :  { %2788 = vmatprep.subr.bf16.mxu0 %v3027_v0  ;;  %v2975_v28 = vpop.eup %2974 }
0x1c9e   :  { %v1818_v63 = vmul.f32 %v2975_v28, %v2971_v54 }
0x1ca1   :  { %v2977_v62 = vpop.eup %2976 }
0x1ca2   :  { %v1819_v1 = vmul.f32 %v2977_v62, %v2973_v57 }
0x1ca4   :  { %v1820_v4 = vpack.c.bf16 %v1819_v1, %v1818_v63 }
0x1ca6   :  { %2779 = vmatmul.mubr.msk.bf16.vlgmr.msra.gmra.mrb[28].mxu0 %vm410_vm5, %v1820_v4 }
0x1ca7   :  { %2789 = vmatpush3.bf16.xpose.msra.mxu0 %v1928_v5  ;;  %2790 = vmatprep.mubr.msk.bf16.mxu0 %vm3028_vm3, %v3027_v0 }
0x1ca8   :  { %2800 = vmatprep.subr.bf16.mxu0 %v3027_v0 }
0x1cae   :  { %2791 = vmatmul.mubr.msk.bf16.vlgmr.msra.gmra.mrb[32].mxu0 %vm358_vm4, %v1921_v20 }
0x1caf   :  { %2802 = vmatprep.mubr.msk.bf16.mxu0 %vm3028_vm3, %v3027_v0  ;;  %2801 = vmatpush3.bf16.msra.mxu0 %v2052_v38  ;;  %v2502_v38 = vld [vmem:[%s3693_s11 + $0x1] ss:$0 sm:$0xff] }
0x1cb0   :  { %2814 = vmatprep.subr.bf16.mxu0 %v3027_v0 }
0x1d79   :  { %v1863_v8 = vpop.f32.mrb[28].mxu0 }
0x1d7a   :  { %v2780_v9 = vpop.f32.mrb[29].mxu0 }
0x1d7b   :  { %v1866_v10 = vpop.f32.mrb[30].mxu0 }
0x1d7c   :  { %v1870_v11 = vpack.c.bf16 %v1866_v10, %v1863_v8  ;;  %v2781_v52 = vpop.f32.mrb[31].mxu0 }
0x1d7e   :  { %2785 = vmatmul.mubr.msk.bf16.vlgmr.msra.gmra.mrb[68].mxu1 %vm358_vm4, %v1870_v11 }
0x1d7f   :  { %2796 = vmatprep.mubr.msk.bf16.mxu1 %vm3028_vm3, %v3027_v0 }
0x1d81   :  { %v1964_v55 = vpop.f32.mrb[32].mxu0 }
0x1d82   :  { %v1971_v12 = vmul.f32 0.35355338, %v1964_v55  ;;  %v2792_v13 = vpop.f32.mrb[33].mxu0 }
0x1d83   :  { %v1967_v14 = vpop.f32.mrb[34].mxu0  ;;  %v2886_v13 = vld [vmem:[%s3692_s10 + $0x10] sm:$0xff]  }
0x1d84   :  { %v1972_v15 = vmul.f32 0.35355338, %v1967_v14  ;;  %v2793_v16 = vpop.f32.mrb[35].mxu0  ;;  %v1973_v17 = vadd.f32 %v3535_v39, %v1971_v12  ;;  %v2887_v14 = vld [vmem:[%s3692_s10 + $0x18] sm:$0xff]  }
0x1d86   :  { %v1975_v18 = vsel %vm410_vm5, %v1973_v17, -inf  ;;  %v1974_v19 = vadd.f32 %v3542_v42, %v1972_v15 }
0x1d87   :  { %1976 = vmax.xlane.f32.xlu1 %v1975_v18 }
0x1d88   :  { %v1978_v21 = vsel %vm414_vm6, %v1974_v19, -inf }
0x1d89   :  { %1979 = vmax.xlane.f32.xlu0 %v1978_v21 }
0x1d98   :  { %1998 = vrot.lane.b32.xlu1 %v3458_v2, %s3039_s20 }
0x1e14   :  { %v1977_v22 = vpop.xlane.xlu1 %1976 }
0x1e15   :  { %v1981_v23 = vsub.f32 %v1973_v17, %v1977_v22 }
0x1e16   :  { %v1980_v25 = vpop.xlane.xlu0 %1979 }
0x1e17   :  { %v1983_v30 = vmul.f32 1.442695, %v1981_v23  ;;  %v1982_v33 = vsub.f32 %v1974_v19, %v1980_v25 }
0x1e18   :  { %v1999_v47 = vpop.permute.xlu1 %1998 }
0x1e19   :  { %2978 = vpow2.f32 %v1983_v30  ;;  %v1985_v35 = vmul.f32 1.442695, %v1982_v33  ;;  %v2004_v26 = vsel %vm440_vm7, %v1999_v47, 0  ;;  %v2888_v47 = vld [vmem:[%s3694_s12 + $0x40] sm:$0xff]  }
0x1e1a   :  { %2795 = vmatpush3.bf16.msra.mxu1 %v2004_v26  ;;  %v2890_v26 = vld [vmem:[%s3694_s12 + $0x50] sm:$0xff]  }
0x1e1b   :  { %2980 = vpow2.f32 %v1985_v35  ;;  %2806 = vmatprep.subr.bf16.mxu1 %v3027_v0  ;;  %v2889_v35 = vld [vmem:[%s3694_s12 + $0x48] sm:$0xff]  }
0x1e23   :  { %v2979_v36 = vpop.eup %2978 }
0x1e24   :  { %v1987_v37 = vsel %vm410_vm5, %v2979_v36, 0.0 }
0x1e25   :  { %v2981_v51 = vpop.eup %2980  ;;  %1988 = vadd.xlane.f32.xlu0 %v1987_v37  ;;  %v2892_v37 = vld [vmem:[%s3694_s12 + $0x60] sm:$0xff]  }
0x1e26   :  { %v1990_v2 = vsel %vm414_vm6, %v2981_v51, 0.0 }
0x1e29   :  { %1991 = vadd.xlane.f32.xlu0 %v1990_v2  ;;  %v2894_v2 = vld [vmem:[%s3694_s12 + $0x70] sm:$0xff]  }
0x1e51   :  { %v1911_v39 = vpop.f32.mrb[68].mxu1 }
0x1e52   :  { %v1918_v40 = vadd.f32 %v1911_v39, %v3528_v31  ;;  %v2786_v41 = vpop.f32.mrb[69].mxu1 }
0x1e53   :  { %v1914_v42 = vpop.f32.mrb[70].mxu1 }
0x1e54   :  { %v1919_v43 = vadd.f32 %v1914_v42, %v3530_v34  ;;  %v2787_v44 = vpop.f32.mrb[71].mxu1 }
0x1eb2   :  { %v1989_v45 = vpop.xlane.xlu0 %1988 }
0x1eb3   :  { %2982 = vrcp.f32 %v1989_v45 }
0x1eb6   :  { %v1992_v46 = vpop.xlane.xlu0 %1991 }
0x1eb7   :  { %2984 = vrcp.f32 %v1992_v46 }
0x1ebd   :  { %v2983_v48 = vpop.eup %2982 }
0x1ebe   :  { %v1995_v50 = vmul.f32 %v2983_v48, %v2979_v36  ;;  %v2891_v36 = vld [vmem:[%s3694_s12 + $0x58] sm:$0xff]  }
0x1ec1   :  { %v2985_v49 = vpop.eup %2984 }
0x1ec2   :  { %v1996_v53 = vmul.f32 %v2985_v49, %v2981_v51  ;;  %v2893_v51 = vld [vmem:[%s3694_s12 + $0x68] sm:$0xff]  }
0x1ec4   :  { %v1997_v54 = vpack.c.bf16 %v1996_v53, %v1995_v50 }
0x1ec6   :  { %2797 = vmatmul.mubr.msk.bf16.vlgmr.msra.gmra.mrb[72].mxu1 %vm410_vm5, %v1997_v54 }
0x1ec7   :  { %2810 = vmatprep.mubr.msk.bf16.mxu1 %vm3028_vm3, %v3027_v0  ;;  %2807 = vmatpush3.bf16.msra.mxu1 %v2886_v13 }
0x1ec8   :  { %2808 = vmatprep.subr.bf16.mxu1 %v3027_v0 }
0x1ecb   :  { %2809 = vmatpush3.bf16.msra.mxu1 %v2887_v14 }
0x1ecc   :  { %2834 = vmatprep.subr.bf16.mxu1 %v3027_v0 }
0x1f99   :  { %v2040_v31 = vpop.f32.mrb[72].mxu1 }
0x1f9a   :  { %v2798_v56 = vpop.f32.mrb[73].mxu1 }
0x1f9b   :  { %v2043_v57 = vpop.f32.mrb[74].mxu1 }
0x1f9c   :  { %v2047_v58 = vpack.c.bf16 %v2043_v57, %v2040_v31  ;;  %v2799_v34 = vpop.f32.mrb[75].mxu1 }
0x1f9e   :  { %2803 = vmatmul.mubr.msk.bf16.vlgmr.msra.gmra.mrb[36].mxu0 %vm358_vm4, %v2047_v58 }
0x1f9f   :  { %2830 = vmatprep.mubr.msk.bf16.mxu0 %vm3028_vm3, %v3027_v0  ;;  %2815 = vmatpush3.bf16.msra.mxu0 %v2888_v47 }
0x1fa0   :  { %2816 = vmatprep.subr.bf16.mxu0 %v3027_v0 }
0x1fa3   :  { %2817 = vmatpush3.bf16.msra.mxu0 %v2889_v35 }
0x1fa4   :  { %2818 = vmatprep.subr.bf16.mxu0 %v3027_v0 }
0x1fa7   :  { %2819 = vmatpush3.bf16.msra.mxu0 %v2890_v26 }
0x1fa8   :  { %2820 = vmatprep.subr.bf16.mxu0 %v3027_v0 }
0x1fab   :  { %2821 = vmatpush3.bf16.msra.mxu0 %v2891_v36 }
0x1fac   :  { %2822 = vmatprep.subr.bf16.mxu0 %v3027_v0 }
0x1faf   :  { %2823 = vmatpush3.bf16.msra.mxu0 %v2892_v37 }
0x1fb0   :  { %2824 = vmatprep.subr.bf16.mxu0 %v3027_v0 }
0x1fb3   :  { %2825 = vmatpush3.bf16.msra.mxu0 %v2893_v51 }
0x1fb4   :  { %2826 = vmatprep.subr.bf16.mxu0 %v3027_v0 }
0x1fb7   :  { %2827 = vmatpush3.bf16.msra.mxu0 %v2894_v2 }
0x1fb8   :  { %2828 = vmatprep.subr.bf16.mxu0 %v3027_v0 }
0x1fbb   :  { %2829 = vmatpush3.bf16.msra.mxu0 %v2895_v29 }
0x2071   :  { %v2088_v59 = vpop.f32.mrb[36].mxu0 }
0x2072   :  { %v2095_v60 = vadd.f32 %v2088_v59, %v1918_v40  ;;  %v2804_v24 = vpop.f32.mrb[37].mxu0 }
0x2073   :  { %v2091_v28 = vpop.f32.mrb[38].mxu0  ;;  %v2532_v24 = vld [vmem:[%s3695_s13 + $0x1] ss:$0 sm:$0xff] }
0x2074   :  { %v2097_v62 = vadd.f32 %v2095_v60, %v3431_v27  ;;  %v2096_v63 = vadd.f32 %v2091_v28, %v1919_v43  ;;  %v2805_v1 = vpop.f32.mrb[39].mxu0 }
0x2076   :  { %v3599_v3 = vadd.f32 %v2497_v61, %v2097_v62  ;;  %v2098_v4 = vadd.f32 %v2096_v63, %v3434_v32 }
0x2078   :  { %v2106_v5 = vsel %vm209_vm1, %v3599_v3, 0.0  ;;  %v2105_v20 = vadd.f32 %v2497_v61, %v2098_v4 }
0x2079   :  { %2107 = vadd.xlane.f32.xlu0 %v2106_v5 }
0x207a   :  { %v2109_v6 = vsel %vm213_vm2, %v2105_v20, 0.0 }
0x207d   :  { %2110 = vadd.xlane.f32.xlu0 %v2109_v6 }
0x2106   :  { %v2108_v7 = vpop.xlane.xlu0 %2107 }
0x2107   :  { %v2112_v8 = vmul.f32 0.03125, %v2108_v7 }
0x2109   :  { %v2114_v9 = vsub.f32 %v3599_v3, %v2112_v8 }
0x210a   :  { %v2111_v10 = vpop.xlane.xlu0 %2110 }
0x210b   :  { %v2113_v27 = vmul.f32 0.03125, %v2111_v10  ;;  %v2116_v11 = vmul.f32 %v2114_v9, %v2114_v9 }
0x210d   :  { %v2115_v52 = vsub.f32 %v2105_v20, %v2113_v27  ;;  %v2118_v55 = vsel %vm209_vm1, %v2116_v11, 0.0 }
0x210e   :  { %2119 = vadd.xlane.f32.xlu0 %v2118_v55 }
0x210f   :  { %v2117_v32 = vmul.f32 %v2115_v52, %v2115_v52 }
0x2111   :  { %v2121_v12 = vsel %vm213_vm2, %v2117_v32, 0.0 }
0x2112   :  { %2122 = vadd.xlane.f32.xlu0 %v2121_v12  ;;  %v2533_v12 = vld [vmem:[%s3697_s15] ss:$0 sm:$0xff] }
0x219b   :  { %v2120_v15 = vpop.xlane.xlu0 %2119 }
0x219c   :  { %v2124_v16 = vmul.f32 0.03125, %v2120_v15 }
0x219e   :  { %v2126_v17 = vadd.f32 1e-05, %v2124_v16 }
0x219f   :  { %v2123_v18 = vpop.xlane.xlu0 %2122 }
0x21a0   :  { %v2125_v19 = vmul.f32 0.03125, %v2123_v18  ;;  %2986 = vrsqrt.f32 %v2126_v17 }
0x21a2   :  { %v2127_v21 = vadd.f32 1e-05, %v2125_v19 }
0x21a4   :  { %2988 = vrsqrt.f32 %v2127_v21 }
0x21aa   :  { %v2987_v22 = vpop.eup %2986 }
0x21ab   :  { %v2130_v25 = vmul.f32 %v2987_v22, %v2114_v9  ;;  %v2896_v9 = vld [vmem:[%s3696_s14] sm:$0xff]  }
0x21ae   :  { %v2989_v23 = vpop.eup %2988 }
0x21af   :  { %v2131_v30 = vmul.f32 %v2989_v23, %v2115_v52 }
0x21b1   :  { %v2137_v33 = vpack.c.bf16 %v2131_v30, %v2130_v25 }
0x21b3   :  { %2811 = vmatmul.mubr.msk.bf16.vlgmr.msra.gmra.mrb[76].mxu1 %vm209_vm1, %v2137_v33 }
0x21b4   :  { %2838 = vmatprep.mubr.msk.bf16.mxu1 %vm3028_vm3, %v3027_v0  ;;  %2835 = vmatpush3.bf16.msra.mxu1 %v2896_v9 }
0x21b5   :  { %2836 = vmatprep.subr.bf16.mxu1 %v3027_v0 }
0x2286   :  { %v2192_v39 = vpop.f32.mrb[76].mxu1 }
0x2287   :  { %v2193_v40 = vadd.f32 %v2502_v38, %v2192_v39  ;;  %v2812_v41 = vpop.f32.mrb[77].mxu1 }
0x2288   :  { %v2195_v42 = vpop.f32.mrb[78].mxu1 }
0x2289   :  { %v2506_v43 = vmul.f32 -1.702, %v2193_v40  ;;  %v2196_v44 = vadd.f32 %v2502_v38, %v2195_v42  ;;  %v2813_v45 = vpop.f32.mrb[79].mxu1 }
0x228b   :  { %v2203_v46 = vmul.f32 1.442695, %v2506_v43  ;;  %v2507_v48 = vmul.f32 -1.702, %v2196_v44 }
0x228d   :  { %2990 = vpow2.f32 %v2203_v46  ;;  %v2205_v49 = vmul.f32 1.442695, %v2507_v48 }
0x228f   :  { %2992 = vpow2.f32 %v2205_v49 }
0x2297   :  { %v2991_v50 = vpop.eup %2990 }
0x2298   :  { %v2207_v53 = vadd.f32 1.0, %v2991_v50 }
0x2299   :  { %v2993_v54 = vpop.eup %2992 }
0x229a   :  { %2994 = vrcp.f32 %v2207_v53  ;;  %v2208_v31 = vadd.f32 1.0, %v2993_v54 }
0x229c   :  { %2996 = vrcp.f32 %v2208_v31 }
0x22a4   :  { %v2995_v56 = vpop.eup %2994 }
0x22a5   :  { %v2213_v58 = vmul.f32 %v2995_v56, %v2193_v40 }
0x22a6   :  { %v2997_v57 = vpop.eup %2996 }
0x22a7   :  { %v2214_v34 = vmul.f32 %v2997_v57, %v2196_v44 }
0x22a9   :  { %v2232_v59 = vpack.c.bf16 %v2214_v34, %v2213_v58 }
0x22ab   :  { %2831 = vmatmul.mubr.bf16.vlgmr.msra.gmra.mrb[40].mxu0 %v2232_v59 }
0x237e   :  { %v2315_v60 = vpop.f32.mrb[40].mxu0 }
0x237f   :  { %v2321_v61 = vadd.f32 %v2315_v60, %v3599_v3  ;;  %v2832_v28 = vpop.f32.mrb[41].mxu0  ;;  %v2897_v3 = vld [vmem:[%s3696_s14 + $0x8] sm:$0xff]   ;;  %s3002_s14 = scalar_lea.vmem %s2417_s25, 32 }
0x2380   :  { %v2318_v62 = vpop.f32.mrb[42].mxu0  ;;  %2837 = vmatpush3.bf16.msra.mxu1 %v2897_v3  ;;  %p3003_p0 = scmp.ne.s32.totalorder %s2417_s25, %s3002_s14  ;;  %p3008_p2 = scmp.lt.s32.totalorder %s3002_s14, %s3002_s14 }
0x2381   :  { %v2833_v63 = vpop.f32.mrb[43].mxu0  ;;  %v2327_v1 = vadd.f32 %v2532_v24, %v2321_v61 }
0x2382   :  { %p3009_p3 = por %p3008_p2, %p3007_p1 }
0x2383   :  { %v2328_v4 = vsel %vm213_vm2, %v2327_v1, 0.0 }
0x2384   :  { %2329 = vadd.xlane.f32.xlu1 %v2328_v4  ;;  %p3010_p4 = pnand %p3009_p3, %p3003_p0 }
0x2411   :  { %v2330_v5 = vpop.xlane.xlu1 %2329 }
0x2412   :  { %v2331_v20 = vmul.f32 0.03125, %v2330_v5 }
0x2414   :  { %v2332_v6 = vsub.f32 %v2327_v1, %v2331_v20 }
0x2416   :  { %v2333_v7 = vmul.f32 %v2332_v6, %v2332_v6 }
0x2418   :  { %v2334_v8 = vsel %vm213_vm2, %v2333_v7, 0.0 }
0x2419   :  { %2335 = vadd.xlane.f32.xlu0 %v2334_v8 }
0x24a6   :  { %v2336_v10 = vpop.xlane.xlu0 %2335 }
0x24a7   :  { %v2337_v27 = vmul.f32 0.03125, %v2336_v10 }
0x24a9   :  { %v2338_v11 = vadd.f32 1e-05, %v2337_v27 }
0x24ab   :  { %2998 = vrsqrt.f32 %v2338_v11 }
0x24b5   :  { %v2999_v52 = vpop.eup %2998 }
0x24b6   :  { %v2340_v55 = vmul.f32 %v2999_v52, %v2332_v6 }
0x24b8   :  { %v2345_v32 = vpack.c.bf16 %v2340_v55, %v2340_v55 }
0x24ba   :  { %2839 = vmatmul.mubr.msk.bf16.vlgmr.msra.gmra.mrb[80].mxu1 %vm209_vm1, %v2345_v32 }
0x258d   :  { %v2402_v0 = vpop.f32.mrb[80].mxu1 }
0x258e   :  { %v2403_v13 = vadd.f32 %v2533_v12, %v2402_v0  ;;  %v2840_v14 = vpop.f32.mrb[81].mxu1 }
0x258f   :  { %v2405_v15 = vpop.f32.mrb[82].mxu1 }
0x2590   :  { %v2841_v16 = vpop.f32.mrb[83].mxu1  ;;  %2409 = vst.msk [vmem:[#allocation2] sm:$0x3] %vm2408_vm9, %v2403_v13 }
0x2591   :  { %3013 = shalt.err (!%p3010_p4)
}
0x2592   :  { %s3014_s15 = scalar_lea.hbm %s3698_s16, 32 }
0x2593   :  { %p3015_p5 = scmp.ne.s32.totalorder %s3698_s16, %s3014_s15  ;;  %p3018_p6 = scmp.lt.u32.totalorder %s3014_s15, %s3698_s16 }
0x2595   :  { %p3020_p7 = pnand %p3018_p6, %p3015_p5 }
0x2597   :  { %3023 = shalt.err (!%p3020_p7)
}
0x2598   :  { %2419 = dma.vmem_to_hbm [thread:$0]  %s2417_s25, 32, %s3698_s16, [#allocation3]  }
0x2599   :  { %3024 = dma.done.wait [#allocation3], 32  }
0x259a   :  { %3025 = vsyncadd [#allocation3], 4294967264 }
0x259b   :  { %2423 = vsyncpa [#allocation3], 1 }

</bundles_post_ra>
